<compile_context>
chip_gen: v7x
topology: tpu7x:2x2x1
jax: 0.10.0
libtpu: 0.0.40
codegen_flags: <defaults>
</compile_context>

<pallas_src>
import functools

import jax
import jax.numpy as jnp
from jax import lax
from jax.experimental import pallas as pl
from jax.experimental.pallas import tpu as pltpu

NEG_SLOPE = 0.2      # DGL GATConv default LeakyReLU negative slope
_NEG_BIG = 1e30      # additive off-edge bias (exp underflows to exactly 0)
_LANE = 128


def _elu(x):
    # nn.ELU(), alpha = 1.0
    return jnp.where(x > 0, x, jnp.exp(x) - 1.0)


def _round_up(x, m):
    return ((x + m - 1) // m) * m


def _vmem_limit_bytes():
    """Generation-aware VMEM limit (v7x: 64 MiB/TC; v5e/v6e: 128 MiB)."""
    try:
        cap = int(pltpu.get_tpu_info().vmem_capacity_bytes)
    except Exception:
        cap = 64 << 20
    return int(min(cap // 2 + (8 << 20), 64 << 20))


def _fit_lanes(x, n_to):
    """Slice / zero-pad the last (lane) dim of a 2-D array to n_to."""
    n_cur = x.shape[-1]
    if n_cur == n_to:
        return x
    if n_cur > n_to:
        return x[:, :n_to]
    return jnp.pad(x, ((0, 0), (0, n_to - n_cur)))


def _fit_rows(x, n_to):
    """Slice / zero-pad the first dim of a 2-D array to n_to."""
    n_cur = x.shape[0]
    if n_cur == n_to:
        return x
    if n_cur > n_to:
        return x[:n_to, :]
    return jnp.pad(x, ((0, n_to - n_cur), (0, 0)))


def _attention_tiles(n, hd, adj_bytes, budget):
    """Pick (t_src, t_dst) tiles for the flash-style attention kernel."""
    if n <= 256:
        return n, n                                  # whole graph in one block
    n128 = _round_up(n, _LANE)
    # >= 2 dst tiles so the "parallel" dst axis can split across v7x's 2 TCs
    td_cap = max(_LANE, ((n128 // 2) // _LANE) * _LANE)
    dst_opts = [t for t in (1024, 512, 256, 128) if t <= td_cap] or [_LANE]
    src_opts = sorted({t for t in (n128, 2048, 1024, 512, 256, 128)
                       if t <= n128}, reverse=True)

    def fits(ts, td):
        ws = (ts * td * (2 * adj_bytes + 20)   # adj dbl-buf + f32 cast + e/p temps
              + 8 * hd * ts                    # featT tile (double-buffered)
              + 12 * hd * td                   # out tile (dbl-buf) + accumulator
              + 64 * (ts + td))                # el/er/m/s scratch + slack
        return ws <= budget

    for td in dst_opts:                        # prefer the largest dst tile
        for ts in src_opts:                    # then the largest src tile
            if fits(ts, td):
                return ts, td
    return _LANE, _LANE


# ---------------------------------------------------------------------------
# Kernel 1: projection (transposed layout), one wide MXU matmul.
#   featT = W_all^T @ x^T          (H*D, Tn)
#   erT   = (W_all a_r)^T @ x^T    (H,   Tn)   (dst-node attention logits)
#   el    = x (W_all a_l)          (Tn,  H)    (src-node logits, column layout)
# ---------------------------------------------------------------------------
def project_kernel(xT_ref, wcatT_ref, wl_ref, featT_ref, erT_ref, el_ref, *,
                   hd):
    xT = xT_ref[...]                                            # (F_in, Tn)
    proj = jnp.dot(wcatT_ref[...], xT,
                   preferred_element_type=jnp.float32)          # (H*D + H, Tn)
    featT_ref[...] = proj[:hd, :]
    erT_ref[...] = proj[hd:, :]
    # el in (node, head) orientation: contraction over F_in (axis 0 of both).
    el_ref[...] = lax.dot_general(
        xT, wl_ref[...], dimension_numbers=(((0,), (0,)), ((), ())),
        preferred_element_type=jnp.float32)                     # (Tn, H)


# ---------------------------------------------------------------------------
# Kernel 2: attention + online softmax + aggregation, transposed layout.
# Grid: (n_dst_tiles [parallel], n_src_tiles [arbitrary, innermost]).
# Scratch (per dst tile): running max m (H, Td), running sum s (H, Td),
# unnormalized accumulator acc (H*D, Td).
# ---------------------------------------------------------------------------
def attention_kernel(adj_ref, featT_ref, el_ref, erT_ref, bias_ref, out_ref,
                     m_sc, s_sc, acc_sc, *, num_heads, head_dim):
    s_idx = pl.program_id(1)

    @pl.when(s_idx == 0)
    def _init():
        m_sc[...] = jnp.full(m_sc.shape, -jnp.inf, jnp.float32)
        s_sc[...] = jnp.zeros(s_sc.shape, jnp.float32)
        acc_sc[...] = jnp.zeros(acc_sc.shape, jnp.float32)

    adj = adj_ref[...].astype(jnp.float32)          # (Ts, Td), bf16 -> f32
    neg_bias = (adj - 1.0) * _NEG_BIG               # 0 on edges, -1e30 off-edge
    featT = featT_ref[...]                          # (H*D, Ts)
    el = el_ref[...]                                # (Ts, H)
    er = erT_ref[...]                               # (H, Td)

    for h in range(num_heads):                      # static unroll; H is tiny
        lo = h * head_dim
        hi = lo + head_dim
        # logits e[i, j] = leaky_relu(el[i] + er[j]) + mask_bias[i, j]
        e = el[:, h:h + 1] + er[h:h + 1, :]                       # (Ts, Td)
        e = jnp.maximum(e, NEG_SLOPE * e) + neg_bias
        # online softmax over src (axis 0)
        m_prev = m_sc[h:h + 1, :]                                 # (1, Td)
        m_new = jnp.maximum(m_prev, jnp.max(e, axis=0, keepdims=True))
        corr = jnp.exp(m_prev - m_new)
        p = jnp.exp(e - m_new)                                    # unnormalized
        s_sc[h:h + 1, :] = (corr * s_sc[h:h + 1, :]
                            + jnp.sum(p, axis=0, keepdims=True))
        # MXU aggregation in transposed layout: (D, Ts) @ (Ts, Td) -> (D, Td)
        pv = jnp.dot(featT[lo:hi, :], p, preferred_element_type=jnp.float32)
        acc_sc[lo:hi, :] = corr * acc_sc[lo:hi, :] + pv
        m_sc[h:h + 1, :] = m_new

    @pl.when(s_idx == pl.num_programs(1) - 1)
    def _finalize():
        bias = bias_ref[...]                                      # (H*D, 1)
        for h in range(num_heads):
            lo = h * head_dim
            hi = lo + head_dim
            inv = pl.reciprocal(jnp.maximum(s_sc[h:h + 1, :], 1e-20),
                                approx=True)                      # EUP (1, Td)
            rst = acc_sc[lo:hi, :] * inv + bias[lo:hi, :]
            out_ref[lo:hi, :] = _elu(rst)           # lane-dense slab store


# ---------------------------------------------------------------------------
# Kernel 3: residual linear + ELU + learned fuse (transposed layout):
#   outT = fw * xT + (1 - fw) * elu(Wr^T @ res^T + br)
# ---------------------------------------------------------------------------
def fuse_kernel(xT_ref, resT_ref, wrT_ref, br_ref, fw_ref, out_ref):
    fw = fw_ref[0]                                  # scalar from SMEM
    r = jnp.dot(wrT_ref[...], resT_ref[...],
                preferred_element_type=jnp.float32) + br_ref[...]
    out_ref[...] = fw * xT_ref[...] + (1.0 - fw) * _elu(r)


# ---------------------------------------------------------------------------
# Wrappers
# ---------------------------------------------------------------------------
def gat_layer(xT, adj_p, n, ts, td, w, attn_l, attn_r, bias, vmem_limit):
    """One GATConv layer (+ head concat + module-level ELU), transposed layout.

    xT:    (F_in, N)       node features (feature, node)
    adj_p: (N_sp, N_dp)    bf16 adjacency, zero-padded to the attention grid
    Returns the (H*D, N) layer output (post-bias, post-ELU), transposed.
    """
    num_heads, f_in, d = w.shape
    hd = num_heads * d
    n_sp, n_dp = adj_p.shape

    # --- parameter prep (tiny, constant-folded under jit) -------------------
    w_all = jnp.transpose(w, (1, 0, 2)).reshape(f_in, hd)         # (F_in, H*D)
    eyeh = jnp.eye(num_heads, dtype=jnp.float32)
    a_l = (attn_l.reshape(num_heads, d, 1)
           * eyeh.reshape(num_heads, 1, num_heads)).reshape(hd, num_heads)
    a_r = (attn_r.reshape(num_heads, d, 1)
           * eyeh.reshape(num_heads, 1, num_heads)).reshape(hd, num_heads)
    w_el = w_all @ a_l                                            # (F_in, H)
    w_er = w_all @ a_r                                            # (F_in, H)
    wcat_t = jnp.concatenate([w_all, w_er], axis=1).T             # (H*D+H, F_in)
    bias_col = bias.reshape(hd, 1)                                # (H*D, 1)

    # --- projection (node-axis grid, "parallel") ----------------------------
    tn = n if n <= 1024 else 512
    n_pp = _round_up(n, tn)
    xT_p = _fit_lanes(xT, n_pp)
    featT, erT, el = pl.pallas_call(
        functools.partial(project_kernel, hd=hd),
        out_shape=(jax.ShapeDtypeStruct((hd, n_pp), jnp.float32),
                   jax.ShapeDtypeStruct((num_heads, n_pp), jnp.float32),
                   jax.ShapeDtypeStruct((n_pp, num_heads), jnp.float32)),
        grid_spec=pltpu.PrefetchScalarGridSpec(
            num_scalar_prefetch=0,
            grid=(n_pp // tn,),
            in_specs=[
                pl.BlockSpec((f_in, tn), lambda i: (0, i)),
                pl.BlockSpec((hd + num_heads, f_in), lambda i: (0, 0)),
                pl.BlockSpec((f_in, num_heads), lambda i: (0, 0)),
            ],
            out_specs=[
                pl.BlockSpec((hd, tn), lambda i: (0, i)),
                pl.BlockSpec((num_heads, tn), lambda i: (0, i)),
                pl.BlockSpec((tn, num_heads), lambda i: (i, 0)),
            ]),
        compiler_params=pltpu.CompilerParams(
            dimension_semantics=("parallel",),
            vmem_limit_bytes=vmem_limit),
        cost_estimate=pl.CostEstimate(
            flops=2 * n_pp * f_in * (hd + 2 * num_heads),
            transcendentals=0,
            bytes_accessed=4 * (n_pp * f_in + f_in * (hd + 2 * num_heads)
                                + n_pp * (hd + 2 * num_heads))),
    )(xT_p, wcat_t, w_el)

    # re-fit node axes to the attention tile grid (no-ops when unpadded)
    featT_a = _fit_lanes(featT, n_sp)
    el_a = _fit_rows(el, n_sp)
    erT_a = _fit_lanes(erT, n_dp)

    # --- flash-style attention / softmax / aggregation ----------------------
    grid = (n_dp // td, n_sp // ts)
    out_t = pl.pallas_call(
        functools.partial(attention_kernel, num_heads=num_heads, head_dim=d),
        out_shape=jax.ShapeDtypeStruct((hd, n_dp), jnp.float32),
        grid_spec=pltpu.PrefetchScalarGridSpec(
            num_scalar_prefetch=0,
            grid=grid,
            in_specs=[
                pl.BlockSpec((ts, td), lambda j, s: (s, j)),          # adj
                pl.BlockSpec((hd, ts), lambda j, s: (0, s)),          # featT
                pl.BlockSpec((ts, num_heads), lambda j, s: (s, 0)),   # el
                pl.BlockSpec((num_heads, td), lambda j, s: (0, j)),   # erT
                pl.BlockSpec((hd, 1), lambda j, s: (0, 0)),           # bias
            ],
            out_specs=pl.BlockSpec((hd, td), lambda j, s: (0, j)),
            scratch_shapes=[
                pltpu.VMEM((num_heads, td), jnp.float32),   # running max
                pltpu.VMEM((num_heads, td), jnp.float32),   # running sum
                pltpu.VMEM((hd, td), jnp.float32),          # accumulator
            ]),
        compiler_params=pltpu.CompilerParams(
            dimension_semantics=("parallel", "arbitrary"),
            vmem_limit_bytes=vmem_limit),
        cost_estimate=pl.CostEstimate(
            flops=2 * n_sp * n_dp * hd + 8 * num_heads * n_sp * n_dp,
            transcendentals=num_heads * n_sp * n_dp,
            bytes_accessed=(2 * n_sp * n_dp
                            + 4 * hd * (n_sp * (n_dp // td) + n_dp))),
    )(adj_p, featT_a, el_a, erT_a, bias_col)

    # TODO(synk): cast featT / p to bfloat16 (f32 accumulate) once tolerance-
    # tested; kept f32 here since the MXU is not the binding unit.
    return out_t[:, :n]                                           # (H*D, N)


def fuse(xT, residual_features, wr, br, fw, vmem_limit):
    """out = fw * x + (1 - fw) * elu(residual_features @ Wr + br), (N, out)."""
    n = residual_features.shape[0]
    in_dim, out_dim = wr.shape
    assert xT.shape[0] == out_dim, "hidden_dims[-1] must equal out_dim"

    tn = n if n <= 1024 else 512
    n_p = _round_up(n, tn)
    xT_p = _fit_lanes(xT, n_p)
    resT_p = _fit_lanes(residual_features.T, n_p)
    wr_t = wr.T                                                   # (out, in)
    br_col = br.reshape(out_dim, 1)

    out_t = pl.pallas_call(
        fuse_kernel,
        out_shape=jax.ShapeDtypeStruct((out_dim, n_p), jnp.float32),
        grid_spec=pltpu.PrefetchScalarGridSpec(
            num_scalar_prefetch=0,
            grid=(n_p // tn,),
            in_specs=[
                pl.BlockSpec((out_dim, tn), lambda i: (0, i)),
                pl.BlockSpec((in_dim, tn), lambda i: (0, i)),
                pl.BlockSpec((out_dim, in_dim), lambda i: (0, 0)),
                pl.BlockSpec((out_dim, 1), lambda i: (0, 0)),
                pl.BlockSpec(memory_space=pltpu.MemorySpace.SMEM),
            ],
            out_specs=pl.BlockSpec((out_dim, tn), lambda i: (0, i))),
        compiler_params=pltpu.CompilerParams(
            dimension_semantics=("parallel",),
            vmem_limit_bytes=vmem_limit),
        cost_estimate=pl.CostEstimate(
            flops=2 * n_p * in_dim * out_dim + 6 * n_p * out_dim,
            transcendentals=n_p * out_dim,
            bytes_accessed=4 * (n_p * (in_dim + 2 * out_dim)
                                + in_dim * out_dim)),
    )(xT_p, resT_p, wr_t, br_col, fw)
    return out_t[:, :n].T                                         # (N, out_dim)


# ---------------------------------------------------------------------------
# Parameter init (deterministic, synthetic — mirrors module __init__ shapes)
# ---------------------------------------------------------------------------
def init_gat_params(key, input_dim, hidden_dims, out_dim, num_heads):
    layers = []
    in_dim = input_dim
    for idx, hidden_dim in enumerate(hidden_dims):
        out_heads = num_heads if idx < len(hidden_dims) - 1 else 1
        key, k1, k2, k3, k4 = jax.random.split(key, 5)
        w = jax.random.normal(k1, (out_heads, in_dim, hidden_dim), jnp.float32) * 0.1
        al = jax.random.normal(k2, (out_heads, 1, hidden_dim), jnp.float32) * 0.1
        ar = jax.random.normal(k3, (out_heads, 1, hidden_dim), jnp.float32) * 0.1
        b = jax.random.normal(k4, (out_heads, 1, hidden_dim), jnp.float32) * 0.1
        layers.append((w, al, ar, b))
        in_dim = hidden_dim * out_heads
    key, k5, k6 = jax.random.split(key, 3)
    wr = jax.random.normal(k5, (input_dim, out_dim), jnp.float32) * 0.1
    br = jax.random.normal(k6, (1, out_dim), jnp.float32) * 0.1
    fw = jnp.full((1,), 0.5, jnp.float32)      # fuse_weight.data.fill_(0.5)
    return dict(layers=layers, wr=wr, br=br, fuse=fw)


def gat_forward(params, adj, features, residual_features):
    # TODO(synk): feat_drop dropout is identity here (eval-mode forward).
    n = features.shape[0]
    assert adj.shape == (n, n), "square adjacency (homogeneous graph) expected"

    vmem_limit = _vmem_limit_bytes()
    budget = max(vmem_limit - (8 << 20), 16 << 20)
    max_hd = max(w.shape[0] * w.shape[2] for (w, _, _, _) in params["layers"])
    ts, td = _attention_tiles(n, max_hd, adj_bytes=2, budget=budget)
    n_sp = _round_up(n, ts)
    n_dp = _round_up(n, td)

    # adjacency: bf16 (half the HBM traffic / VMEM of f32; exact for 0/1),
    # zero-padded once to the attention tile grid and shared by every layer.
    adj_p = adj.astype(jnp.bfloat16)
    if (n_sp, n_dp) != (n, n):
        adj_p = jnp.pad(adj_p, ((0, n_sp - n), (0, n_dp - n)))

    xT = features.T                       # transposed (feature, node) layout
    for (w, al, ar, b) in params["layers"]:
        xT = gat_layer(xT, adj_p, n, ts, td, w, al, ar, b, vmem_limit)

    return fuse(xT, residual_features, params["wr"], params["br"],
                params["fuse"], vmem_limit)


# ---------------------------------------------------------------------------
# Pure-JAX reference (for a loose numerical self-check)
# ---------------------------------------------------------------------------
def _gat_reference(params, adj, features, residual_features):
    def elu(x):
        return jnp.where(x > 0, x, jnp.exp(x) - 1.0)

    mask = adj > 0
    x = features
    for (w, al, ar, b) in params["layers"]:
        h, _, d = w.shape
        feat = jnp.einsum("nf,hfd->nhd", x, w)                    # (N, H, D)
        el = jnp.einsum("nhd,hd->nh", feat, al.reshape(h, d))     # (N, H)
        er = jnp.einsum("nhd,hd->nh", feat, ar.reshape(h, d))     # (N, H)
        e = el[:, None, :] + er[None, :, :]                       # (src, dst, H)
        e = jnp.where(e > 0, e, NEG_SLOPE * e)
        e = jnp.where(mask[:, :, None], e, -jnp.inf)
        alpha = jax.nn.softmax(e, axis=0)
        alpha = jnp.where(mask[:, :, None], alpha, 0.0)
        rst = jnp.einsum("sdh,shf->dhf", alpha, feat)             # (dst, H, D)
        rst = rst + b.reshape(h, d)[None, :, :]
        x = elu(rst.reshape(x.shape[0], -1))
    fw = params["fuse"][0]
    res = elu(residual_features @ params["wr"] + params["br"])
    return fw * x + (1.0 - fw) * res


if __name__ == "__main__":
    key = jax.random.PRNGKey(0)
    N = 16
    input_dim, hidden_dims, out_dim, num_heads = 8, [16, 8], 8, 2

    key, ka, kf, kr = jax.random.split(key, 4)
    # deterministic random digraph with self-loops (every node has >=1 in-edge)
    adj = (jax.random.uniform(ka, (N, N)) > 0.6).astype(jnp.float32)
    adj = jnp.clip(adj + jnp.eye(N, dtype=jnp.float32), 0.0, 1.0)
    features = jax.random.normal(kf, (N, input_dim), jnp.float32)
    residual_features = jax.random.normal(kr, (N, input_dim), jnp.float32)

    params = init_gat_params(jax.random.PRNGKey(42), input_dim, hidden_dims,
                             out_dim, num_heads)

    fwd = jax.jit(gat_forward)
    out = fwd(params, adj, features, residual_features)
    jax.block_until_ready(out)
    assert out.shape == (N, out_dim)

    ref = _gat_reference(params, adj, features, residual_features)
    max_err = float(jnp.max(jnp.abs(out - ref)))
    assert max_err < 1e-2, f"kernel/reference mismatch: {max_err}"

    print("KERNEL_OK")
</pallas_src>

<mosaic_0001>
module attributes {stable_mosaic.version = 11 : i64} {
  func.func @project_kernel(%arg0: i32, %arg1: memref<8x16xf32, #tpu.memory_space<vmem>>, %arg2: memref<34x8xf32, #tpu.memory_space<vmem>>, %arg3: memref<8x2xf32, #tpu.memory_space<vmem>>, %arg4: memref<32x16xf32, #tpu.memory_space<vmem>>, %arg5: memref<2x16xf32, #tpu.memory_space<vmem>>, %arg6: memref<16x2xf32, #tpu.memory_space<vmem>>) attributes {dimension_semantics = [#tpu.dimension_semantics<parallel>], iteration_bounds = array<i64: 1>, scalar_prefetch = 0 : i64, scratch_operands = 0 : i64, tpu.core_type = #tpu.core_type<tc>, window_params = [{transform_indices = @transform_0, window_bounds = array<i64: 8, 16>}, {pipeline_mode = #tpu.pipeline_mode<synchronous>, transform_indices = @transform_1, window_bounds = array<i64: 34, 8>}, {pipeline_mode = #tpu.pipeline_mode<synchronous>, transform_indices = @transform_2, window_bounds = array<i64: 8, 2>}, {transform_indices = @transform_3, window_bounds = array<i64: 32, 16>}, {transform_indices = @transform_4, window_bounds = array<i64: 2, 16>}, {transform_indices = @transform_5, window_bounds = array<i64: 16, 2>}]} {
    %c0 = arith.constant 0 : index
    %c0_0 = arith.constant 0 : index
    %0 = vector.load %arg1[%c0, %c0_0] : memref<8x16xf32, #tpu.memory_space<vmem>>, vector<8x16xf32>
    %c0_1 = arith.constant 0 : index
    %c0_2 = arith.constant 0 : index
    %1 = vector.load %arg2[%c0_1, %c0_2] : memref<34x8xf32, #tpu.memory_space<vmem>>, vector<34x8xf32>
    %cst = arith.constant dense<0.000000e+00> : vector<34x16xf32>
    %2 = tpu.matmul %1, %0, %cst {dimension_numbers = #tpu.dot_dimension_numbers<[1], [0], [0], [1], [0, 0, 1, 1], [], []>} : vector<34x8xf32>, vector<8x16xf32>, vector<34x16xf32> -> vector<34x16xf32>
    %3 = vector.extract_strided_slice %2 {offsets = [0, 0], sizes = [32, 16], strides = [1, 1]} : vector<34x16xf32> to vector<32x16xf32>
    %c0_3 = arith.constant 0 : index
    %c0_4 = arith.constant 0 : index
    %4 = vector.load %arg4[%c0_3, %c0_4] : memref<32x16xf32, #tpu.memory_space<vmem>>, vector<32x16xf32>
    tpu.vector_store %arg4[%c0_3, %c0_4], %3 {strides = array<i32>} : memref<32x16xf32, #tpu.memory_space<vmem>>, vector<32x16xf32>,
    %5 = vector.extract_strided_slice %2 {offsets = [32, 0], sizes = [2, 16], strides = [1, 1]} : vector<34x16xf32> to vector<2x16xf32>
    %c0_5 = arith.constant 0 : index
    %c0_6 = arith.constant 0 : index
    %6 = vector.load %arg5[%c0_5, %c0_6] : memref<2x16xf32, #tpu.memory_space<vmem>>, vector<2x16xf32>
    tpu.vector_store %arg5[%c0_5, %c0_6], %5 {strides = array<i32>} : memref<2x16xf32, #tpu.memory_space<vmem>>, vector<2x16xf32>,
    %c0_7 = arith.constant 0 : index
    %c0_8 = arith.constant 0 : index
    %7 = vector.load %arg3[%c0_7, %c0_8] : memref<8x2xf32, #tpu.memory_space<vmem>>, vector<8x2xf32>
    %cst_9 = arith.constant dense<0.000000e+00> : vector<16x2xf32>
    %8 = tpu.matmul %0, %7, %cst_9 {dimension_numbers = #tpu.dot_dimension_numbers<[0], [0], [1], [1], [0, 1, 1, 1], [], []>} : vector<8x16xf32>, vector<8x2xf32>, vector<16x2xf32> -> vector<16x2xf32>
    %c0_10 = arith.constant 0 : index
    %c0_11 = arith.constant 0 : index
    %9 = vector.load %arg6[%c0_10, %c0_11] : memref<16x2xf32, #tpu.memory_space<vmem>>, vector<16x2xf32>
    tpu.vector_store %arg6[%c0_10, %c0_11], %8 {strides = array<i32>} : memref<16x2xf32, #tpu.memory_space<vmem>>, vector<16x2xf32>,
    return
  }
  func.func @transform_0(%arg0: i32) -> (i32, i32) {
    %c0_i32 = arith.constant 0 : i32
    %c0_i32_0 = arith.constant 0 : i32
    return %c0_i32, %arg0 : i32, i32
  }
  func.func @transform_1(%arg0: i32) -> (i32, i32) {
    %c0_i32 = arith.constant 0 : i32
    %c0_i32_0 = arith.constant 0 : i32
    %c0_i32_1 = arith.constant 0 : i32
    return %c0_i32, %c0_i32_0 : i32, i32
  }
  func.func @transform_2(%arg0: i32) -> (i32, i32) {
    %c0_i32 = arith.constant 0 : i32
    %c0_i32_0 = arith.constant 0 : i32
    %c0_i32_1 = arith.constant 0 : i32
    return %c0_i32, %c0_i32_0 : i32, i32
  }
  func.func @transform_3(%arg0: i32) -> (i32, i32) {
    %c0_i32 = arith.constant 0 : i32
    %c0_i32_0 = arith.constant 0 : i32
    return %c0_i32, %arg0 : i32, i32
  }
  func.func @transform_4(%arg0: i32) -> (i32, i32) {
    %c0_i32 = arith.constant 0 : i32
    %c0_i32_0 = arith.constant 0 : i32
    return %c0_i32, %arg0 : i32, i32
  }
  func.func @transform_5(%arg0: i32) -> (i32, i32) {
    %c0_i32 = arith.constant 0 : i32
    %c0_i32_0 = arith.constant 0 : i32
    return %arg0, %c0_i32 : i32, i32
  }
}

module attributes {stable_mosaic.version = 11 : i64} {
  func.func @attention_kernel(%arg0: i32, %arg1: i32, %arg2: memref<16x16xbf16, #tpu.memory_space<vmem>>, %arg3: memref<32x16xf32, #tpu.memory_space<vmem>>, %arg4: memref<16x2xf32, #tpu.memory_space<vmem>>, %arg5: memref<2x16xf32, #tpu.memory_space<vmem>>, %arg6: memref<32x1xf32, #tpu.memory_space<vmem>>, %arg7: memref<32x16xf32, #tpu.memory_space<vmem>>, %arg8: memref<2x16xf32, #tpu.memory_space<vmem>>, %arg9: memref<2x16xf32, #tpu.memory_space<vmem>>, %arg10: memref<32x16xf32, #tpu.memory_space<vmem>>) attributes {dimension_semantics = [#tpu.dimension_semantics<parallel>, #tpu.dimension_semantics<arbitrary>], iteration_bounds = array<i64: 1, 1>, scalar_prefetch = 0 : i64, scratch_operands = 3 : i64, tpu.core_type = #tpu.core_type<tc>, window_params = [{transform_indices = @transform_0, window_bounds = array<i64: 16, 16>}, {transform_indices = @transform_1, window_bounds = array<i64: 32, 16>}, {transform_indices = @transform_2, window_bounds = array<i64: 16, 2>}, {transform_indices = @transform_3, window_bounds = array<i64: 2, 16>}, {pipeline_mode = #tpu.pipeline_mode<synchronous>, transform_indices = @transform_4, window_bounds = array<i64: 32, 1>}, {transform_indices = @transform_5, window_bounds = array<i64: 32, 16>}]} {
    %c0_i32 = arith.constant 0 : i32
    %0 = arith.cmpi eq, %arg1, %c0_i32 : i32
    %1 = arith.extui %0 : i1 to i32
    %c0_i32_0 = arith.constant 0 : i32
    %2 = arith.cmpi ne, %1, %c0_i32_0 : i32
    scf.if %2 {
      %cst_41 = arith.constant 0xFF800000 : f32
      %79 = vector.broadcast %cst_41 : f32 to vector<2x16xf32>
      %c0_42 = arith.constant 0 : index
      %c0_43 = arith.constant 0 : index
      %80 = vector.load %arg8[%c0_42, %c0_43] : memref<2x16xf32, #tpu.memory_space<vmem>>, vector<2x16xf32>
      tpu.vector_store %arg8[%c0_42, %c0_43], %79 {strides = array<i32>} : memref<2x16xf32, #tpu.memory_space<vmem>>, vector<2x16xf32>,
      %cst_44 = arith.constant 0.000000e+00 : f32
      %81 = vector.broadcast %cst_44 : f32 to vector<2x16xf32>
      %c0_45 = arith.constant 0 : index
      %c0_46 = arith.constant 0 : index
      %82 = vector.load %arg9[%c0_45, %c0_46] : memref<2x16xf32, #tpu.memory_space<vmem>>, vector<2x16xf32>
      tpu.vector_store %arg9[%c0_45, %c0_46], %81 {strides = array<i32>} : memref<2x16xf32, #tpu.memory_space<vmem>>, vector<2x16xf32>,
      %cst_47 = arith.constant 0.000000e+00 : f32
      %83 = vector.broadcast %cst_47 : f32 to vector<32x16xf32>
      %c0_48 = arith.constant 0 : index
      %c0_49 = arith.constant 0 : index
      %84 = vector.load %arg10[%c0_48, %c0_49] : memref<32x16xf32, #tpu.memory_space<vmem>>, vector<32x16xf32>
      tpu.vector_store %arg10[%c0_48, %c0_49], %83 {strides = array<i32>} : memref<32x16xf32, #tpu.memory_space<vmem>>, vector<32x16xf32>,
    } else {
    }
    %c0 = arith.constant 0 : index
    %c0_1 = arith.constant 0 : index
    %3 = vector.load %arg2[%c0, %c0_1] : memref<16x16xbf16, #tpu.memory_space<vmem>>, vector<16x16xbf16>
    %4 = arith.extf %3 : vector<16x16xbf16> to vector<16x16xf32>
    %cst = arith.constant 1.000000e+00 : f32
    %5 = vector.broadcast %cst : f32 to vector<16x16xf32>
    %6 = arith.subf %4, %5 : vector<16x16xf32>
    %cst_2 = arith.constant 1.000000e+30 : f32
    %7 = vector.broadcast %cst_2 : f32 to vector<16x16xf32>
    %8 = arith.mulf %6, %7 : vector<16x16xf32>
    %c0_3 = arith.constant 0 : index
    %c0_4 = arith.constant 0 : index
    %9 = vector.load %arg3[%c0_3, %c0_4] : memref<32x16xf32, #tpu.memory_space<vmem>>, vector<32x16xf32>
    %c0_5 = arith.constant 0 : index
    %c0_6 = arith.constant 0 : index
    %10 = vector.load %arg4[%c0_5, %c0_6] : memref<16x2xf32, #tpu.memory_space<vmem>>, vector<16x2xf32>
    %c0_7 = arith.constant 0 : index
    %c0_8 = arith.constant 0 : index
    %11 = vector.load %arg5[%c0_7, %c0_8] : memref<2x16xf32, #tpu.memory_space<vmem>>, vector<2x16xf32>
    %12 = vector.extract_strided_slice %10 {offsets = [0, 0], sizes = [16, 1], strides = [1, 1]} : vector<16x2xf32> to vector<16x1xf32>
    %13 = vector.extract_strided_slice %11 {offsets = [0, 0], sizes = [1, 16], strides = [1, 1]} : vector<2x16xf32> to vector<1x16xf32>
    %14 = vector.broadcast %12 : vector<16x1xf32> to vector<16x16xf32>
    %15 = vector.broadcast %13 : vector<1x16xf32> to vector<16x16xf32>
    %16 = arith.addf %14, %15 : vector<16x16xf32>
    %cst_9 = arith.constant 2.000000e-01 : f32
    %17 = vector.broadcast %cst_9 : f32 to vector<16x16xf32>
    %18 = arith.mulf %17, %16 : vector<16x16xf32>
    %19 = arith.maximumf %16, %18 : vector<16x16xf32>
    %20 = arith.addf %19, %8 : vector<16x16xf32>
    %c0_10 = arith.constant 0 : index
    %c0_11 = arith.constant 0 : index
    %21 = vector.load %arg8[%c0_10, %c0_11] : memref<2x16xf32, #tpu.memory_space<vmem>>, vector<1x16xf32>
    %cst_12 = arith.constant dense<0xFF800000> : vector<16xf32>
    %22 = vector.multi_reduction <maximumf>, %20, %cst_12 [0] : vector<16x16xf32> to vector<16xf32>
    %23 = vector.shape_cast %22 : vector<16xf32> to vector<1x16xf32>
    %24 = arith.maximumf %21, %23 : vector<1x16xf32>
    %25 = arith.subf %21, %24 : vector<1x16xf32>
    %26 = math.exp %25 : vector<1x16xf32>
    %27 = vector.broadcast %24 : vector<1x16xf32> to vector<16x16xf32>
    %28 = arith.subf %20, %27 : vector<16x16xf32>
    %29 = math.exp %28 : vector<16x16xf32>
    %c0_13 = arith.constant 0 : index
    %c0_14 = arith.constant 0 : index
    %30 = vector.load %arg9[%c0_13, %c0_14] : memref<2x16xf32, #tpu.memory_space<vmem>>, vector<1x16xf32>
    %31 = arith.mulf %26, %30 : vector<1x16xf32>
    %cst_15 = arith.constant dense<0.000000e+00> : vector<16xf32>
    %32 = vector.multi_reduction <add>, %29, %cst_15 [0] : vector<16x16xf32> to vector<16xf32>
    %33 = vector.shape_cast %32 : vector<16xf32> to vector<1x16xf32>
    %34 = arith.addf %31, %33 : vector<1x16xf32>
    %c0_16 = arith.constant 0 : index
    %c0_17 = arith.constant 0 : index
    %35 = vector.load %arg9[%c0_16, %c0_17] : memref<2x16xf32, #tpu.memory_space<vmem>>, vector<1x16xf32>
    tpu.vector_store %arg9[%c0_16, %c0_17], %34 {strides = array<i32>} : memref<2x16xf32, #tpu.memory_space<vmem>>, vector<1x16xf32>,
    %36 = vector.extract_strided_slice %9 {offsets = [0, 0], sizes = [16, 16], strides = [1, 1]} : vector<32x16xf32> to vector<16x16xf32>
    %cst_18 = arith.constant dense<0.000000e+00> : vector<16x16xf32>
    %37 = tpu.matmul %36, %29, %cst_18 {dimension_numbers = #tpu.dot_dimension_numbers<[1], [0], [0], [1], [0, 0, 1, 1], [], []>} : vector<16x16xf32>, vector<16x16xf32>, vector<16x16xf32> -> vector<16x16xf32>
    %c0_19 = arith.constant 0 : index
    %c0_20 = arith.constant 0 : index
    %38 = vector.load %arg10[%c0_19, %c0_20] : memref<32x16xf32, #tpu.memory_space<vmem>>, vector<16x16xf32>
    %39 = vector.broadcast %26 : vector<1x16xf32> to vector<16x16xf32>
    %40 = arith.mulf %39, %38 : vector<16x16xf32>
    %41 = arith.addf %40, %37 : vector<16x16xf32>
    %c0_21 = arith.constant 0 : index
    %c0_22 = arith.constant 0 : index
    %42 = vector.load %arg10[%c0_21, %c0_22] : memref<32x16xf32, #tpu.memory_space<vmem>>, vector<16x16xf32>
    tpu.vector_store %arg10[%c0_21, %c0_22], %41 {strides = array<i32>} : memref<32x16xf32, #tpu.memory_space<vmem>>, vector<16x16xf32>,
    %c0_23 = arith.constant 0 : index
    %c0_24 = arith.constant 0 : index
    %43 = vector.load %arg8[%c0_23, %c0_24] : memref<2x16xf32, #tpu.memory_space<vmem>>, vector<1x16xf32>
    tpu.vector_store %arg8[%c0_23, %c0_24], %24 {strides = array<i32>} : memref<2x16xf32, #tpu.memory_space<vmem>>, vector<1x16xf32>,
    %44 = vector.extract_strided_slice %10 {offsets = [0, 1], sizes = [16, 1], strides = [1, 1]} : vector<16x2xf32> to vector<16x1xf32>
    %45 = vector.extract_strided_slice %11 {offsets = [1, 0], sizes = [1, 16], strides = [1, 1]} : vector<2x16xf32> to vector<1x16xf32>
    %46 = vector.broadcast %44 : vector<16x1xf32> to vector<16x16xf32>
    %47 = vector.broadcast %45 : vector<1x16xf32> to vector<16x16xf32>
    %48 = arith.addf %46, %47 : vector<16x16xf32>
    %cst_25 = arith.constant 2.000000e-01 : f32
    %49 = vector.broadcast %cst_25 : f32 to vector<16x16xf32>
    %50 = arith.mulf %49, %48 : vector<16x16xf32>
    %51 = arith.maximumf %48, %50 : vector<16x16xf32>
    %52 = arith.addf %51, %8 : vector<16x16xf32>
    %c1 = arith.constant 1 : index
    %c0_26 = arith.constant 0 : index
    %53 = vector.load %arg8[%c1, %c0_26] : memref<2x16xf32, #tpu.memory_space<vmem>>, vector<1x16xf32>
    %cst_27 = arith.constant dense<0xFF800000> : vector<16xf32>
    %54 = vector.multi_reduction <maximumf>, %52, %cst_27 [0] : vector<16x16xf32> to vector<16xf32>
    %55 = vector.shape_cast %54 : vector<16xf32> to vector<1x16xf32>
    %56 = arith.maximumf %53, %55 : vector<1x16xf32>
    %57 = arith.subf %53, %56 : vector<1x16xf32>
    %58 = math.exp %57 : vector<1x16xf32>
    %59 = vector.broadcast %56 : vector<1x16xf32> to vector<16x16xf32>
    %60 = arith.subf %52, %59 : vector<16x16xf32>
    %61 = math.exp %60 : vector<16x16xf32>
    %c1_28 = arith.constant 1 : index
    %c0_29 = arith.constant 0 : index
    %62 = vector.load %arg9[%c1_28, %c0_29] : memref<2x16xf32, #tpu.memory_space<vmem>>, vector<1x16xf32>
    %63 = arith.mulf %58, %62 : vector<1x16xf32>
    %cst_30 = arith.constant dense<0.000000e+00> : vector<16xf32>
    %64 = vector.multi_reduction <add>, %61, %cst_30 [0] : vector<16x16xf32> to vector<16xf32>
    %65 = vector.shape_cast %64 : vector<16xf32> to vector<1x16xf32>
    %66 = arith.addf %63, %65 : vector<1x16xf32>
    %c1_31 = arith.constant 1 : index
    %c0_32 = arith.constant 0 : index
    %67 = vector.load %arg9[%c1_31, %c0_32] : memref<2x16xf32, #tpu.memory_space<vmem>>, vector<1x16xf32>
    tpu.vector_store %arg9[%c1_31, %c0_32], %66 {strides = array<i32>} : memref<2x16xf32, #tpu.memory_space<vmem>>, vector<1x16xf32>,
    %68 = vector.extract_strided_slice %9 {offsets = [16, 0], sizes = [16, 16], strides = [1, 1]} : vector<32x16xf32> to vector<16x16xf32>
    %cst_33 = arith.constant dense<0.000000e+00> : vector<16x16xf32>
    %69 = tpu.matmul %68, %61, %cst_33 {dimension_numbers = #tpu.dot_dimension_numbers<[1], [0], [0], [1], [0, 0, 1, 1], [], []>} : vector<16x16xf32>, vector<16x16xf32>, vector<16x16xf32> -> vector<16x16xf32>
    %c16 = arith.constant 16 : index
    %c0_34 = arith.constant 0 : index
    %70 = vector.load %arg10[%c16, %c0_34] : memref<32x16xf32, #tpu.memory_space<vmem>>, vector<16x16xf32>
    %71 = vector.broadcast %58 : vector<1x16xf32> to vector<16x16xf32>
    %72 = arith.mulf %71, %70 : vector<16x16xf32>
    %73 = arith.addf %72, %69 : vector<16x16xf32>
    %c16_35 = arith.constant 16 : index
    %c0_36 = arith.constant 0 : index
    %74 = vector.load %arg10[%c16_35, %c0_36] : memref<32x16xf32, #tpu.memory_space<vmem>>, vector<16x16xf32>
    tpu.vector_store %arg10[%c16_35, %c0_36], %73 {strides = array<i32>} : memref<32x16xf32, #tpu.memory_space<vmem>>, vector<16x16xf32>,
    %c1_37 = arith.constant 1 : index
    %c0_38 = arith.constant 0 : index
    %75 = vector.load %arg8[%c1_37, %c0_38] : memref<2x16xf32, #tpu.memory_space<vmem>>, vector<1x16xf32>
    tpu.vector_store %arg8[%c1_37, %c0_38], %56 {strides = array<i32>} : memref<2x16xf32, #tpu.memory_space<vmem>>, vector<1x16xf32>,
    %c0_i32_39 = arith.constant 0 : i32
    %76 = arith.cmpi eq, %arg1, %c0_i32_39 : i32
    %77 = arith.extui %76 : i1 to i32
    %c0_i32_40 = arith.constant 0 : i32
    %78 = arith.cmpi ne, %77, %c0_i32_40 : i32
    scf.if %78 {
      %c0_41 = arith.constant 0 : index
      %c0_42 = arith.constant 0 : index
      %79 = vector.load %arg6[%c0_41, %c0_42] : memref<32x1xf32, #tpu.memory_space<vmem>>, vector<32x1xf32>
      %c0_43 = arith.constant 0 : index
      %c0_44 = arith.constant 0 : index
      %80 = vector.load %arg9[%c0_43, %c0_44] : memref<2x16xf32, #tpu.memory_space<vmem>>, vector<1x16xf32>
      %cst_45 = arith.constant 9.99999968E-21 : f32
      %81 = vector.broadcast %cst_45 : f32 to vector<1x16xf32>
      %82 = arith.maximumf %80, %81 : vector<1x16xf32>
      %83 = tpu.reciprocal %82 {approx = true} : vector<1x16xf32> -> vector<1x16xf32>
      %c0_46 = arith.constant 0 : index
      %c0_47 = arith.constant 0 : index
      %84 = vector.load %arg10[%c0_46, %c0_47] : memref<32x16xf32, #tpu.memory_space<vmem>>, vector<16x16xf32>
      %85 = vector.broadcast %83 : vector<1x16xf32> to vector<16x16xf32>
      %86 = arith.mulf %84, %85 : vector<16x16xf32>
      %87 = vector.extract_strided_slice %79 {offsets = [0, 0], sizes = [16, 1], strides = [1, 1]} : vector<32x1xf32> to vector<16x1xf32>
      %88 = vector.broadcast %87 : vector<16x1xf32> to vector<16x16xf32>
      %89 = arith.addf %86, %88 : vector<16x16xf32>
      %cst_48 = arith.constant 0.000000e+00 : f32
      %90 = vector.broadcast %cst_48 : f32 to vector<16x16xf32>
      %91 = arith.cmpf ogt, %89, %90 : vector<16x16xf32>
      %92 = math.exp %89 : vector<16x16xf32>
      %cst_49 = arith.constant 1.000000e+00 : f32
      %93 = vector.broadcast %cst_49 : f32 to vector<16x16xf32>
      %94 = arith.subf %92, %93 : vector<16x16xf32>
      %95 = arith.select %91, %89, %94 : vector<16x16xi1>, vector<16x16xf32>
      %c0_50 = arith.constant 0 : index
      %c0_51 = arith.constant 0 : index
      %96 = vector.load %arg7[%c0_50, %c0_51] : memref<32x16xf32, #tpu.memory_space<vmem>>, vector<16x16xf32>
      tpu.vector_store %arg7[%c0_50, %c0_51], %95 {strides = array<i32>} : memref<32x16xf32, #tpu.memory_space<vmem>>, vector<16x16xf32>,
      %c1_52 = arith.constant 1 : index
      %c0_53 = arith.constant 0 : index
      %97 = vector.load %arg9[%c1_52, %c0_53] : memref<2x16xf32, #tpu.memory_space<vmem>>, vector<1x16xf32>
      %cst_54 = arith.constant 9.99999968E-21 : f32
      %98 = vector.broadcast %cst_54 : f32 to vector<1x16xf32>
      %99 = arith.maximumf %97, %98 : vector<1x16xf32>
      %100 = tpu.reciprocal %99 {approx = true} : vector<1x16xf32> -> vector<1x16xf32>
      %c16_55 = arith.constant 16 : index
      %c0_56 = arith.constant 0 : index
      %101 = vector.load %arg10[%c16_55, %c0_56] : memref<32x16xf32, #tpu.memory_space<vmem>>, vector<16x16xf32>
      %102 = vector.broadcast %100 : vector<1x16xf32> to vector<16x16xf32>
      %103 = arith.mulf %101, %102 : vector<16x16xf32>
      %104 = vector.extract_strided_slice %79 {offsets = [16, 0], sizes = [16, 1], strides = [1, 1]} : vector<32x1xf32> to vector<16x1xf32>
      %105 = vector.broadcast %104 : vector<16x1xf32> to vector<16x16xf32>
      %106 = arith.addf %103, %105 : vector<16x16xf32>
      %cst_57 = arith.constant 0.000000e+00 : f32
      %107 = vector.broadcast %cst_57 : f32 to vector<16x16xf32>
      %108 = arith.cmpf ogt, %106, %107 : vector<16x16xf32>
      %109 = math.exp %106 : vector<16x16xf32>
      %cst_58 = arith.constant 1.000000e+00 : f32
      %110 = vector.broadcast %cst_58 : f32 to vector<16x16xf32>
      %111 = arith.subf %109, %110 : vector<16x16xf32>
      %112 = arith.select %108, %106, %111 : vector<16x16xi1>, vector<16x16xf32>
      %c16_59 = arith.constant 16 : index
      %c0_60 = arith.constant 0 : index
      %113 = vector.load %arg7[%c16_59, %c0_60] : memref<32x16xf32, #tpu.memory_space<vmem>>, vector<16x16xf32>
      tpu.vector_store %arg7[%c16_59, %c0_60], %112 {strides = array<i32>} : memref<32x16xf32, #tpu.memory_space<vmem>>, vector<16x16xf32>,
    } else {
    }
    return
  }
  func.func @transform_0(%arg0: i32, %arg1: i32) -> (i32, i32) {
    %c0_i32 = arith.constant 0 : i32
    return %arg1, %arg0 : i32, i32
  }
  func.func @transform_1(%arg0: i32, %arg1: i32) -> (i32, i32) {
    %c0_i32 = arith.constant 0 : i32
    %c0_i32_0 = arith.constant 0 : i32
    return %c0_i32, %arg1 : i32, i32
  }
  func.func @transform_2(%arg0: i32, %arg1: i32) -> (i32, i32) {
    %c0_i32 = arith.constant 0 : i32
    %c0_i32_0 = arith.constant 0 : i32
    return %arg1, %c0_i32 : i32, i32
  }
  func.func @transform_3(%arg0: i32, %arg1: i32) -> (i32, i32) {
    %c0_i32 = arith.constant 0 : i32
    %c0_i32_0 = arith.constant 0 : i32
    return %c0_i32, %arg0 : i32, i32
  }
  func.func @transform_4(%arg0: i32, %arg1: i32) -> (i32, i32) {
    %c0_i32 = arith.constant 0 : i32
    %c0_i32_0 = arith.constant 0 : i32
    %c0_i32_1 = arith.constant 0 : i32
    return %c0_i32, %c0_i32_0 : i32, i32
  }
  func.func @transform_5(%arg0: i32, %arg1: i32) -> (i32, i32) {
    %c0_i32 = arith.constant 0 : i32
    %c0_i32_0 = arith.constant 0 : i32
    return %c0_i32, %arg0 : i32, i32
  }
}

module attributes {stable_mosaic.version = 11 : i64} {
  func.func @project_kernel(%arg0: i32, %arg1: memref<32x16xf32, #tpu.memory_space<vmem>>, %arg2: memref<9x32xf32, #tpu.memory_space<vmem>>, %arg3: memref<32x1xf32, #tpu.memory_space<vmem>>, %arg4: memref<8x16xf32, #tpu.memory_space<vmem>>, %arg5: memref<1x16xf32, #tpu.memory_space<vmem>>, %arg6: memref<16x1xf32, #tpu.memory_space<vmem>>) attributes {dimension_semantics = [#tpu.dimension_semantics<parallel>], iteration_bounds = array<i64: 1>, scalar_prefetch = 0 : i64, scratch_operands = 0 : i64, tpu.core_type = #tpu.core_type<tc>, window_params = [{transform_indices = @transform_0, window_bounds = array<i64: 32, 16>}, {pipeline_mode = #tpu.pipeline_mode<synchronous>, transform_indices = @transform_1, window_bounds = array<i64: 9, 32>}, {pipeline_mode = #tpu.pipeline_mode<synchronous>, transform_indices = @transform_2, window_bounds = array<i64: 32, 1>}, {transform_indices = @transform_3, window_bounds = array<i64: 8, 16>}, {transform_indices = @transform_4, window_bounds = array<i64: 1, 16>}, {transform_indices = @transform_5, window_bounds = array<i64: 16, 1>}]} {
    %c0 = arith.constant 0 : index
    %c0_0 = arith.constant 0 : index
    %0 = vector.load %arg1[%c0, %c0_0] : memref<32x16xf32, #tpu.memory_space<vmem>>, vector<32x16xf32>
    %c0_1 = arith.constant 0 : index
    %c0_2 = arith.constant 0 : index
    %1 = vector.load %arg2[%c0_1, %c0_2] : memref<9x32xf32, #tpu.memory_space<vmem>>, vector<9x32xf32>
    %cst = arith.constant dense<0.000000e+00> : vector<9x16xf32>
    %2 = tpu.matmul %1, %0, %cst {dimension_numbers = #tpu.dot_dimension_numbers<[1], [0], [0], [1], [0, 0, 1, 1], [], []>} : vector<9x32xf32>, vector<32x16xf32>, vector<9x16xf32> -> vector<9x16xf32>
    %3 = vector.extract_strided_slice %2 {offsets = [0, 0], sizes = [8, 16], strides = [1, 1]} : vector<9x16xf32> to vector<8x16xf32>
    %c0_3 = arith.constant 0 : index
    %c0_4 = arith.constant 0 : index
    %4 = vector.load %arg4[%c0_3, %c0_4] : memref<8x16xf32, #tpu.memory_space<vmem>>, vector<8x16xf32>
    tpu.vector_store %arg4[%c0_3, %c0_4], %3 {strides = array<i32>} : memref<8x16xf32, #tpu.memory_space<vmem>>, vector<8x16xf32>,
    %5 = vector.extract_strided_slice %2 {offsets = [8, 0], sizes = [1, 16], strides = [1, 1]} : vector<9x16xf32> to vector<1x16xf32>
    %c0_5 = arith.constant 0 : index
    %c0_6 = arith.constant 0 : index
    %6 = vector.load %arg5[%c0_5, %c0_6] : memref<1x16xf32, #tpu.memory_space<vmem>>, vector<1x16xf32>
    tpu.vector_store %arg5[%c0_5, %c0_6], %5 {strides = array<i32>} : memref<1x16xf32, #tpu.memory_space<vmem>>, vector<1x16xf32>,
    %c0_7 = arith.constant 0 : index
    %c0_8 = arith.constant 0 : index
    %7 = vector.load %arg3[%c0_7, %c0_8] : memref<32x1xf32, #tpu.memory_space<vmem>>, vector<32x1xf32>
    %cst_9 = arith.constant dense<0.000000e+00> : vector<16x1xf32>
    %8 = tpu.matmul %0, %7, %cst_9 {dimension_numbers = #tpu.dot_dimension_numbers<[0], [0], [1], [1], [0, 1, 1, 1], [], []>} : vector<32x16xf32>, vector<32x1xf32>, vector<16x1xf32> -> vector<16x1xf32>
    %c0_10 = arith.constant 0 : index
    %c0_11 = arith.constant 0 : index
    %9 = vector.load %arg6[%c0_10, %c0_11] : memref<16x1xf32, #tpu.memory_space<vmem>>, vector<16x1xf32>
    tpu.vector_store %arg6[%c0_10, %c0_11], %8 {strides = array<i32>} : memref<16x1xf32, #tpu.memory_space<vmem>>, vector<16x1xf32>,
    return
  }
  func.func @transform_0(%arg0: i32) -> (i32, i32) {
    %c0_i32 = arith.constant 0 : i32
    %c0_i32_0 = arith.constant 0 : i32
    return %c0_i32, %arg0 : i32, i32
  }
  func.func @transform_1(%arg0: i32) -> (i32, i32) {
    %c0_i32 = arith.constant 0 : i32
    %c0_i32_0 = arith.constant 0 : i32
    %c0_i32_1 = arith.constant 0 : i32
    return %c0_i32, %c0_i32_0 : i32, i32
  }
  func.func @transform_2(%arg0: i32) -> (i32, i32) {
    %c0_i32 = arith.constant 0 : i32
    %c0_i32_0 = arith.constant 0 : i32
    %c0_i32_1 = arith.constant 0 : i32
    return %c0_i32, %c0_i32_0 : i32, i32
  }
  func.func @transform_3(%arg0: i32) -> (i32, i32) {
    %c0_i32 = arith.constant 0 : i32
    %c0_i32_0 = arith.constant 0 : i32
    return %c0_i32, %arg0 : i32, i32
  }
  func.func @transform_4(%arg0: i32) -> (i32, i32) {
    %c0_i32 = arith.constant 0 : i32
    %c0_i32_0 = arith.constant 0 : i32
    return %c0_i32, %arg0 : i32, i32
  }
  func.func @transform_5(%arg0: i32) -> (i32, i32) {
    %c0_i32 = arith.constant 0 : i32
    %c0_i32_0 = arith.constant 0 : i32
    return %arg0, %c0_i32 : i32, i32
  }
}

module attributes {stable_mosaic.version = 11 : i64} {
  func.func @attention_kernel(%arg0: i32, %arg1: i32, %arg2: memref<16x16xbf16, #tpu.memory_space<vmem>>, %arg3: memref<8x16xf32, #tpu.memory_space<vmem>>, %arg4: memref<16x1xf32, #tpu.memory_space<vmem>>, %arg5: memref<1x16xf32, #tpu.memory_space<vmem>>, %arg6: memref<8x1xf32, #tpu.memory_space<vmem>>, %arg7: memref<8x16xf32, #tpu.memory_space<vmem>>, %arg8: memref<1x16xf32, #tpu.memory_space<vmem>>, %arg9: memref<1x16xf32, #tpu.memory_space<vmem>>, %arg10: memref<8x16xf32, #tpu.memory_space<vmem>>) attributes {dimension_semantics = [#tpu.dimension_semantics<parallel>, #tpu.dimension_semantics<arbitrary>], iteration_bounds = array<i64: 1, 1>, scalar_prefetch = 0 : i64, scratch_operands = 3 : i64, tpu.core_type = #tpu.core_type<tc>, window_params = [{transform_indices = @transform_0, window_bounds = array<i64: 16, 16>}, {transform_indices = @transform_1, window_bounds = array<i64: 8, 16>}, {transform_indices = @transform_2, window_bounds = array<i64: 16, 1>}, {transform_indices = @transform_3, window_bounds = array<i64: 1, 16>}, {pipeline_mode = #tpu.pipeline_mode<synchronous>, transform_indices = @transform_4, window_bounds = array<i64: 8, 1>}, {transform_indices = @transform_5, window_bounds = array<i64: 8, 16>}]} {
    %c0_i32 = arith.constant 0 : i32
    %0 = arith.cmpi eq, %arg1, %c0_i32 : i32
    %1 = arith.extui %0 : i1 to i32
    %c0_i32_0 = arith.constant 0 : i32
    %2 = arith.cmpi ne, %1, %c0_i32_0 : i32
    scf.if %2 {
      %cst_27 = arith.constant 0xFF800000 : f32
      %44 = vector.broadcast %cst_27 : f32 to vector<1x16xf32>
      %c0_28 = arith.constant 0 : index
      %c0_29 = arith.constant 0 : index
      %45 = vector.load %arg8[%c0_28, %c0_29] : memref<1x16xf32, #tpu.memory_space<vmem>>, vector<1x16xf32>
      tpu.vector_store %arg8[%c0_28, %c0_29], %44 {strides = array<i32>} : memref<1x16xf32, #tpu.memory_space<vmem>>, vector<1x16xf32>,
      %cst_30 = arith.constant 0.000000e+00 : f32
      %46 = vector.broadcast %cst_30 : f32 to vector<1x16xf32>
      %c0_31 = arith.constant 0 : index
      %c0_32 = arith.constant 0 : index
      %47 = vector.load %arg9[%c0_31, %c0_32] : memref<1x16xf32, #tpu.memory_space<vmem>>, vector<1x16xf32>
      tpu.vector_store %arg9[%c0_31, %c0_32], %46 {strides = array<i32>} : memref<1x16xf32, #tpu.memory_space<vmem>>, vector<1x16xf32>,
      %cst_33 = arith.constant 0.000000e+00 : f32
      %48 = vector.broadcast %cst_33 : f32 to vector<8x16xf32>
      %c0_34 = arith.constant 0 : index
      %c0_35 = arith.constant 0 : index
      %49 = vector.load %arg10[%c0_34, %c0_35] : memref<8x16xf32, #tpu.memory_space<vmem>>, vector<8x16xf32>
      tpu.vector_store %arg10[%c0_34, %c0_35], %48 {strides = array<i32>} : memref<8x16xf32, #tpu.memory_space<vmem>>, vector<8x16xf32>,
    } else {
    }
    %c0 = arith.constant 0 : index
    %c0_1 = arith.constant 0 : index
    %3 = vector.load %arg2[%c0, %c0_1] : memref<16x16xbf16, #tpu.memory_space<vmem>>, vector<16x16xbf16>
    %4 = arith.extf %3 : vector<16x16xbf16> to vector<16x16xf32>
    %cst = arith.constant 1.000000e+00 : f32
    %5 = vector.broadcast %cst : f32 to vector<16x16xf32>
    %6 = arith.subf %4, %5 : vector<16x16xf32>
    %cst_2 = arith.constant 1.000000e+30 : f32
    %7 = vector.broadcast %cst_2 : f32 to vector<16x16xf32>
    %8 = arith.mulf %6, %7 : vector<16x16xf32>
    %c0_3 = arith.constant 0 : index
    %c0_4 = arith.constant 0 : index
    %9 = vector.load %arg3[%c0_3, %c0_4] : memref<8x16xf32, #tpu.memory_space<vmem>>, vector<8x16xf32>
    %c0_5 = arith.constant 0 : index
    %c0_6 = arith.constant 0 : index
    %10 = vector.load %arg4[%c0_5, %c0_6] : memref<16x1xf32, #tpu.memory_space<vmem>>, vector<16x1xf32>
    %c0_7 = arith.constant 0 : index
    %c0_8 = arith.constant 0 : index
    %11 = vector.load %arg5[%c0_7, %c0_8] : memref<1x16xf32, #tpu.memory_space<vmem>>, vector<1x16xf32>
    %12 = vector.broadcast %10 : vector<16x1xf32> to vector<16x16xf32>
    %13 = vector.broadcast %11 : vector<1x16xf32> to vector<16x16xf32>
    %14 = arith.addf %12, %13 : vector<16x16xf32>
    %cst_9 = arith.constant 2.000000e-01 : f32
    %15 = vector.broadcast %cst_9 : f32 to vector<16x16xf32>
    %16 = arith.mulf %15, %14 : vector<16x16xf32>
    %17 = arith.maximumf %14, %16 : vector<16x16xf32>
    %18 = arith.addf %17, %8 : vector<16x16xf32>
    %c0_10 = arith.constant 0 : index
    %c0_11 = arith.constant 0 : index
    %19 = vector.load %arg8[%c0_10, %c0_11] : memref<1x16xf32, #tpu.memory_space<vmem>>, vector<1x16xf32>
    %cst_12 = arith.constant dense<0xFF800000> : vector<16xf32>
    %20 = vector.multi_reduction <maximumf>, %18, %cst_12 [0] : vector<16x16xf32> to vector<16xf32>
    %21 = vector.shape_cast %20 : vector<16xf32> to vector<1x16xf32>
    %22 = arith.maximumf %19, %21 : vector<1x16xf32>
    %23 = arith.subf %19, %22 : vector<1x16xf32>
    %24 = math.exp %23 : vector<1x16xf32>
    %25 = vector.broadcast %22 : vector<1x16xf32> to vector<16x16xf32>
    %26 = arith.subf %18, %25 : vector<16x16xf32>
    %27 = math.exp %26 : vector<16x16xf32>
    %c0_13 = arith.constant 0 : index
    %c0_14 = arith.constant 0 : index
    %28 = vector.load %arg9[%c0_13, %c0_14] : memref<1x16xf32, #tpu.memory_space<vmem>>, vector<1x16xf32>
    %29 = arith.mulf %24, %28 : vector<1x16xf32>
    %cst_15 = arith.constant dense<0.000000e+00> : vector<16xf32>
    %30 = vector.multi_reduction <add>, %27, %cst_15 [0] : vector<16x16xf32> to vector<16xf32>
    %31 = vector.shape_cast %30 : vector<16xf32> to vector<1x16xf32>
    %32 = arith.addf %29, %31 : vector<1x16xf32>
    %c0_16 = arith.constant 0 : index
    %c0_17 = arith.constant 0 : index
    %33 = vector.load %arg9[%c0_16, %c0_17] : memref<1x16xf32, #tpu.memory_space<vmem>>, vector<1x16xf32>
    tpu.vector_store %arg9[%c0_16, %c0_17], %32 {strides = array<i32>} : memref<1x16xf32, #tpu.memory_space<vmem>>, vector<1x16xf32>,
    %cst_18 = arith.constant dense<0.000000e+00> : vector<8x16xf32>
    %34 = tpu.matmul %9, %27, %cst_18 {dimension_numbers = #tpu.dot_dimension_numbers<[1], [0], [0], [1], [0, 0, 1, 1], [], []>} : vector<8x16xf32>, vector<16x16xf32>, vector<8x16xf32> -> vector<8x16xf32>
    %c0_19 = arith.constant 0 : index
    %c0_20 = arith.constant 0 : index
    %35 = vector.load %arg10[%c0_19, %c0_20] : memref<8x16xf32, #tpu.memory_space<vmem>>, vector<8x16xf32>
    %36 = vector.broadcast %24 : vector<1x16xf32> to vector<8x16xf32>
    %37 = arith.mulf %36, %35 : vector<8x16xf32>
    %38 = arith.addf %37, %34 : vector<8x16xf32>
    %c0_21 = arith.constant 0 : index
    %c0_22 = arith.constant 0 : index
    %39 = vector.load %arg10[%c0_21, %c0_22] : memref<8x16xf32, #tpu.memory_space<vmem>>, vector<8x16xf32>
    tpu.vector_store %arg10[%c0_21, %c0_22], %38 {strides = array<i32>} : memref<8x16xf32, #tpu.memory_space<vmem>>, vector<8x16xf32>,
    %c0_23 = arith.constant 0 : index
    %c0_24 = arith.constant 0 : index
    %40 = vector.load %arg8[%c0_23, %c0_24] : memref<1x16xf32, #tpu.memory_space<vmem>>, vector<1x16xf32>
    tpu.vector_store %arg8[%c0_23, %c0_24], %22 {strides = array<i32>} : memref<1x16xf32, #tpu.memory_space<vmem>>, vector<1x16xf32>,
    %c0_i32_25 = arith.constant 0 : i32
    %41 = arith.cmpi eq, %arg1, %c0_i32_25 : i32
    %42 = arith.extui %41 : i1 to i32
    %c0_i32_26 = arith.constant 0 : i32
    %43 = arith.cmpi ne, %42, %c0_i32_26 : i32
    scf.if %43 {
      %c0_27 = arith.constant 0 : index
      %c0_28 = arith.constant 0 : index
      %44 = vector.load %arg6[%c0_27, %c0_28] : memref<8x1xf32, #tpu.memory_space<vmem>>, vector<8x1xf32>
      %c0_29 = arith.constant 0 : index
      %c0_30 = arith.constant 0 : index
      %45 = vector.load %arg9[%c0_29, %c0_30] : memref<1x16xf32, #tpu.memory_space<vmem>>, vector<1x16xf32>
      %cst_31 = arith.constant 9.99999968E-21 : f32
      %46 = vector.broadcast %cst_31 : f32 to vector<1x16xf32>
      %47 = arith.maximumf %45, %46 : vector<1x16xf32>
      %48 = tpu.reciprocal %47 {approx = true} : vector<1x16xf32> -> vector<1x16xf32>
      %c0_32 = arith.constant 0 : index
      %c0_33 = arith.constant 0 : index
      %49 = vector.load %arg10[%c0_32, %c0_33] : memref<8x16xf32, #tpu.memory_space<vmem>>, vector<8x16xf32>
      %50 = vector.broadcast %48 : vector<1x16xf32> to vector<8x16xf32>
      %51 = arith.mulf %49, %50 : vector<8x16xf32>
      %52 = vector.broadcast %44 : vector<8x1xf32> to vector<8x16xf32>
      %53 = arith.addf %51, %52 : vector<8x16xf32>
      %cst_34 = arith.constant 0.000000e+00 : f32
      %54 = vector.broadcast %cst_34 : f32 to vector<8x16xf32>
      %55 = arith.cmpf ogt, %53, %54 : vector<8x16xf32>
      %56 = math.exp %53 : vector<8x16xf32>
      %cst_35 = arith.constant 1.000000e+00 : f32
      %57 = vector.broadcast %cst_35 : f32 to vector<8x16xf32>
      %58 = arith.subf %56, %57 : vector<8x16xf32>
      %59 = arith.select %55, %53, %58 : vector<8x16xi1>, vector<8x16xf32>
      %c0_36 = arith.constant 0 : index
      %c0_37 = arith.constant 0 : index
      %60 = vector.load %arg7[%c0_36, %c0_37] : memref<8x16xf32, #tpu.memory_space<vmem>>, vector<8x16xf32>
      tpu.vector_store %arg7[%c0_36, %c0_37], %59 {strides = array<i32>} : memref<8x16xf32, #tpu.memory_space<vmem>>, vector<8x16xf32>,
    } else {
    }
    return
  }
  func.func @transform_0(%arg0: i32, %arg1: i32) -> (i32, i32) {
    %c0_i32 = arith.constant 0 : i32
    return %arg1, %arg0 : i32, i32
  }
  func.func @transform_1(%arg0: i32, %arg1: i32) -> (i32, i32) {
    %c0_i32 = arith.constant 0 : i32
    %c0_i32_0 = arith.constant 0 : i32
    return %c0_i32, %arg1 : i32, i32
  }
  func.func @transform_2(%arg0: i32, %arg1: i32) -> (i32, i32) {
    %c0_i32 = arith.constant 0 : i32
    %c0_i32_0 = arith.constant 0 : i32
    return %arg1, %c0_i32 : i32, i32
  }
  func.func @transform_3(%arg0: i32, %arg1: i32) -> (i32, i32) {
    %c0_i32 = arith.constant 0 : i32
    %c0_i32_0 = arith.constant 0 : i32
    return %c0_i32, %arg0 : i32, i32
  }
  func.func @transform_4(%arg0: i32, %arg1: i32) -> (i32, i32) {
    %c0_i32 = arith.constant 0 : i32
    %c0_i32_0 = arith.constant 0 : i32
    %c0_i32_1 = arith.constant 0 : i32
    return %c0_i32, %c0_i32_0 : i32, i32
  }
  func.func @transform_5(%arg0: i32, %arg1: i32) -> (i32, i32) {
    %c0_i32 = arith.constant 0 : i32
    %c0_i32_0 = arith.constant 0 : i32
    return %c0_i32, %arg0 : i32, i32
  }
}

module attributes {stable_mosaic.version = 11 : i64} {
  func.func @fuse_kernel(%arg0: i32, %arg1: memref<8x16xf32, #tpu.memory_space<vmem>>, %arg2: memref<8x16xf32, #tpu.memory_space<vmem>>, %arg3: memref<8x8xf32, #tpu.memory_space<vmem>>, %arg4: memref<8x1xf32, #tpu.memory_space<vmem>>, %arg5: memref<1xf32, #tpu.memory_space<smem>>, %arg6: memref<8x16xf32, #tpu.memory_space<vmem>>) attributes {dimension_semantics = [#tpu.dimension_semantics<parallel>], iteration_bounds = array<i64: 1>, scalar_prefetch = 0 : i64, scratch_operands = 0 : i64, tpu.core_type = #tpu.core_type<tc>, window_params = [{transform_indices = @transform_0, window_bounds = array<i64: 8, 16>}, {transform_indices = @transform_1, window_bounds = array<i64: 8, 16>}, {pipeline_mode = #tpu.pipeline_mode<synchronous>, transform_indices = @transform_2, window_bounds = array<i64: 8, 8>}, {pipeline_mode = #tpu.pipeline_mode<synchronous>, transform_indices = @transform_3, window_bounds = array<i64: 8, 1>}, {transform_indices = @transform_4, window_bounds = array<i64: 1>}, {transform_indices = @transform_5, window_bounds = array<i64: 8, 16>}]} {
    %c0 = arith.constant 0 : index
    %0 = memref.load %arg5[%c0] : memref<1xf32, #tpu.memory_space<smem>>
    %c0_0 = arith.constant 0 : index
    %c0_1 = arith.constant 0 : index
    %1 = vector.load %arg3[%c0_0, %c0_1] : memref<8x8xf32, #tpu.memory_space<vmem>>, vector<8x8xf32>
    %c0_2 = arith.constant 0 : index
    %c0_3 = arith.constant 0 : index
    %2 = vector.load %arg2[%c0_2, %c0_3] : memref<8x16xf32, #tpu.memory_space<vmem>>, vector<8x16xf32>
    %cst = arith.constant dense<0.000000e+00> : vector<8x16xf32>
    %3 = tpu.matmul %1, %2, %cst {dimension_numbers = #tpu.dot_dimension_numbers<[1], [0], [0], [1], [0, 0, 1, 1], [], []>} : vector<8x8xf32>, vector<8x16xf32>, vector<8x16xf32> -> vector<8x16xf32>
    %c0_4 = arith.constant 0 : index
    %c0_5 = arith.constant 0 : index
    %4 = vector.load %arg4[%c0_4, %c0_5] : memref<8x1xf32, #tpu.memory_space<vmem>>, vector<8x1xf32>
    %5 = vector.broadcast %4 : vector<8x1xf32> to vector<8x16xf32>
    %6 = arith.addf %3, %5 : vector<8x16xf32>
    %c0_6 = arith.constant 0 : index
    %c0_7 = arith.constant 0 : index
    %7 = vector.load %arg1[%c0_6, %c0_7] : memref<8x16xf32, #tpu.memory_space<vmem>>, vector<8x16xf32>
    %8 = vector.broadcast %0 : f32 to vector<8x16xf32>
    %9 = arith.mulf %8, %7 : vector<8x16xf32>
    %cst_8 = arith.constant 1.000000e+00 : f32
    %10 = arith.subf %cst_8, %0 : f32
    %cst_9 = arith.constant 0.000000e+00 : f32
    %11 = vector.broadcast %cst_9 : f32 to vector<8x16xf32>
    %12 = arith.cmpf ogt, %6, %11 : vector<8x16xf32>
    %13 = math.exp %6 : vector<8x16xf32>
    %cst_10 = arith.constant 1.000000e+00 : f32
    %14 = vector.broadcast %cst_10 : f32 to vector<8x16xf32>
    %15 = arith.subf %13, %14 : vector<8x16xf32>
    %16 = arith.select %12, %6, %15 : vector<8x16xi1>, vector<8x16xf32>
    %17 = vector.broadcast %10 : f32 to vector<8x16xf32>
    %18 = arith.mulf %17, %16 : vector<8x16xf32>
    %19 = arith.addf %9, %18 : vector<8x16xf32>
    %c0_11 = arith.constant 0 : index
    %c0_12 = arith.constant 0 : index
    %20 = vector.load %arg6[%c0_11, %c0_12] : memref<8x16xf32, #tpu.memory_space<vmem>>, vector<8x16xf32>
    tpu.vector_store %arg6[%c0_11, %c0_12], %19 {strides = array<i32>} : memref<8x16xf32, #tpu.memory_space<vmem>>, vector<8x16xf32>,
    return
  }
  func.func @transform_0(%arg0: i32) -> (i32, i32) {
    %c0_i32 = arith.constant 0 : i32
    %c0_i32_0 = arith.constant 0 : i32
    return %c0_i32, %arg0 : i32, i32
  }
  func.func @transform_1(%arg0: i32) -> (i32, i32) {
    %c0_i32 = arith.constant 0 : i32
    %c0_i32_0 = arith.constant 0 : i32
    return %c0_i32, %arg0 : i32, i32
  }
  func.func @transform_2(%arg0: i32) -> (i32, i32) {
    %c0_i32 = arith.constant 0 : i32
    %c0_i32_0 = arith.constant 0 : i32
    %c0_i32_1 = arith.constant 0 : i32
    return %c0_i32, %c0_i32_0 : i32, i32
  }
  func.func @transform_3(%arg0: i32) -> (i32, i32) {
    %c0_i32 = arith.constant 0 : i32
    %c0_i32_0 = arith.constant 0 : i32
    %c0_i32_1 = arith.constant 0 : i32
    return %c0_i32, %c0_i32_0 : i32, i32
  }
  func.func @transform_4(%arg0: i32) -> i32 {
    %c0_i32 = arith.constant 0 : i32
    %c0_i32_0 = arith.constant 0 : i32
    return %c0_i32 : i32
  }
  func.func @transform_5(%arg0: i32) -> (i32, i32) {
    %c0_i32 = arith.constant 0 : i32
    %c0_i32_0 = arith.constant 0 : i32
    return %c0_i32, %arg0 : i32, i32
  }
}

</mosaic_0001>

<bundles_post_ra>
// kernel: gat_forward.5
= control target key start
LH: loop header
LB: loop body
LE: loop exit
PB: predicated region body
PF: predicated region fallthrough
CT: control target
= control target key end

     0   :  { %v307_v1 = vmov 0.0   ;;  %vm23_vm0 = vcmask 64512   ;;  %vm308_vm1 = vmmov 0   ;;  %vm129_vm2 = vcmask 130048   ;;  %s392_s0 = inlined_call_operand.vmem [shape: f32[8,16], index: 0, kind: input, shape index: {}]   ;;  %s393_s1 = inlined_call_operand.vmem [shape: f32[34,8], index: 1, kind: input, shape index: {}]   ;;  %s394_s2 = inlined_call_operand.vmem [shape: f32[8,2], index: 2, kind: input, shape index: {}]   ;;  %s395_s3 = inlined_call_operand.vmem [shape: f32[32,16], index: 3, kind: output, shape index: {0}]   ;;  %s396_s4 = inlined_call_operand.vmem [shape: f32[2,16], index: 4, kind: output, shape index: {1}]   ;;  %s397_s5 = inlined_call_operand.vmem [shape: f32[16,2], index: 5, kind: output, shape index: {2}]  }
   0x1   :  { %v17_v0 = vld [vmem:[%s392_s0] sm:$0xff]  ;;  %303 = vmatprep.subr.mxu1 %v307_v1  ;;  %281 = vmatprep.subr.mxu0 %v307_v1  ;;  %v21_v2 = vld [vmem:[%s393_s1 + $0x18] sm:$0xff]  ;;  %v19_v6 = vld [vmem:[%s393_s1 + $0x8] sm:$0xff]  ;;  %vm134_vm3 = vcmask 123904   ;;  %vm250_vm4 = vcmask 15360  }
   0x2   :  { %137 = vxpose.xlu0.b32.start.end [1/1] (short) (narrow) %v17_v0, 16  ;;  %304 = vmatpush3.msra.mxu1 %v17_v0  ;;  %v136_v3 = vld [vmem:[%s394_s2] sm:$0xff]  ;;  %v20_v7 = vld [vmem:[%s393_s1 + $0x10] sm:$0xff] }
   0x3   :  { %v18_v4 = vld [vmem:[%s393_s1] sm:$0xff]  ;;  %292 = vmatprep.mubr.msk.f32.mxu1 %vm308_vm1, %v307_v1  ;;  %282 = vmatpush3.msra.mxu0 %v17_v0 }
   0x4   :  { %283 = vmatprep.mubr.msk.f32.mxu0 %vm308_vm1, %v307_v1  ;;  %293 = vmatmul.mubr.msk.f32.vlgmr.msra.gmra.mrb[0].mxu1 %vm23_vm0, %v21_v2  ;;  %v22_v5 = vld [vmem:[%s393_s1 + $0x20] sm:$0x3] }
   0x5   :  { %298 = vmatprep.subr.mxu1 %v136_v3  ;;  %284 = vmatmul.mubr.msk.f32.vlgmr.msra.gmra.mrb[0].mxu0 %vm23_vm0, %v18_v4 }
   0x6   :  { %299 = vmatpush3.msra.mxu1 %v136_v3  ;;  %295 = vmatprep.mubr.msk.f32.mxu1 %vm308_vm1, %v307_v1 }
   0x7   :  { %286 = vmatprep.mubr.msk.f32.mxu0 %vm308_vm1, %v307_v1 }
   0x8   :  { %296 = vmatmul.mubr.msk.f32.gmra.mrb[2].mxu1 %vm23_vm0, %v22_v5 }
   0x9   :  { %287 = vmatmul.mubr.msk.f32.gmra.mrb[2].mxu0 %vm23_vm0, %v19_v6 }
   0xa   :  { %289 = vmatprep.mubr.msk.f32.mxu0 %vm308_vm1, %v307_v1 }
   0xd   :  { %290 = vmatmul.mubr.msk.f32.gmra.mrb[4].mxu0 %vm23_vm0, %v20_v7 }
  0x82   :  { %v153_v8 = vpop.trf.xlu0 }
  0x83   :  { %300 = vmatprep.mubr.msk.f32.mxu1 %vm23_vm0, %v153_v8 }
  0x86   :  { %v154_v9 = vpop.trf.xlu0 }
  0x87   :  { %301 = vmatmul.mubr.msk.f32.vlgmr.msra.gmra.mrb[4].mxu1 %vm23_vm0, %v154_v9 }
  0xd7   :  { %v120_v10 = vpop.f32.mrb[0].mxu1 }
  0xd8   :  { %133 = vst.msk [vmem:[%s395_s3 + $0x18] sm:$0xff] %vm129_vm2, %v120_v10  ;;  %v105_v11 = vpop.f32.mrb[0].mxu0  ;;  %v294_v12 = vpop.f32.mrb[1].mxu1 }
  0xd9   :  { %130 = vst.msk [vmem:[%s395_s3] sm:$0xff] %vm129_vm2, %v105_v11  ;;  %v285_v13 = vpop.f32.mrb[1].mxu0 }
  0xdb   :  { %v125_v14 = vpop.f32.mrb[2].mxu1 }
  0xdc   :  { %135 = vst.msk [vmem:[%s396_s4] sm:$0x3] %vm134_vm3, %v125_v14  ;;  %v110_v15 = vpop.f32.mrb[2].mxu0  ;;  %v297_v16 = vpop.f32.mrb[3].mxu1 }
  0xdd   :  { %131 = vst.msk [vmem:[%s395_s3 + $0x8] sm:$0xff] %vm129_vm2, %v110_v15  ;;  %v288_v17 = vpop.f32.mrb[3].mxu0 }
  0xe0   :  { %v115_v18 = vpop.f32.mrb[4].mxu0 }
  0xe1   :  { %132 = vst.msk [vmem:[%s395_s3 + $0x10] sm:$0xff] %vm129_vm2, %v115_v18  ;;  %v291_v19 = vpop.f32.mrb[5].mxu0 }
 0x15a   :  { %v302_v20 = vpop.f32.mrb[4].mxu1 }
 0x15b   :  { %252 = vst.msk [vmem:[%s397_s5 + $0x8] sm:$0xff] %vm250_vm4, %v302_v20  ;;  %v241_v21 = vpop.f32.mrb[5].mxu1 }
 0x15c   :  { %251 = vst.msk [vmem:[%s397_s5] sm:$0xff] %vm250_vm4, %v241_v21 }

// kernel: gat_forward.7
= control target key start
LH: loop header
LB: loop body
LE: loop exit
PB: predicated region body
PF: predicated region fallthrough
CT: control target
= control target key end

     0   :  { %vm23_vm0 = vcmask 261120   ;;  %vm107_vm1 = vcmask 122880   ;;  %vm105_vm2 = vcmask 130048   ;;  %vm226_vm3 = vcmask 7168   ;;  %s368_s0 = inlined_call_operand.vmem [shape: f32[32,16], index: 0, kind: input, shape index: {}]   ;;  %s369_s2 = inlined_call_operand.vmem [shape: f32[32,1], index: 2, kind: input, shape index: {}]   ;;  %s370_s1 = inlined_call_operand.vmem [shape: f32[9,32], index: 1, kind: input, shape index: {}]   ;;  %s371_s4 = inlined_call_operand.vmem [shape: f32[1,16], index: 4, kind: output, shape index: {1}]   ;;  %s372_s3 = inlined_call_operand.vmem [shape: f32[8,16], index: 3, kind: output, shape index: {0}]   ;;  %s373_s5 = inlined_call_operand.vmem [shape: f32[16,1], index: 5, kind: output, shape index: {2}]  }
   0x1   :  { %v17_v0 = vld [vmem:[%s368_s0] sm:$0xff]  ;;  %v18_v1 = vld [vmem:[%s368_s0 + $0x8] sm:$0xff]  ;;  %v19_v2 = vld [vmem:[%s368_s0 + $0x10] sm:$0xff] }
   0x2   :  { %113 = vxpose.xlu0.b32.start [1/4] (short) (narrow) %v17_v0, 16  ;;  %v20_v3 = vld [vmem:[%s368_s0 + $0x18] sm:$0xff]  ;;  %v279_v4 = vpack.c.bf16 %v18_v1, %v17_v0  ;;  %v109_v5 = vld [vmem:[%s369_s2] sm:$0xff]  ;;  %v110_v6 = vld [vmem:[%s369_s2 + $0x8] sm:$0xff] }
   0x3   :  { %v283_v7 = vpack.c.bf16 %v20_v3, %v19_v2  ;;  %v287_v8 = vpack.c.bf16 %v110_v6, %v109_v5  ;;  %v111_v9 = vld [vmem:[%s369_s2 + $0x10] sm:$0xff]  ;;  %v112_v10 = vld [vmem:[%s369_s2 + $0x18] sm:$0xff]  ;;  %v21_v12 = vld [vmem:[%s370_s1] sm:$0xff] }
   0x4   :  { %280 = vmatprep.subr.bf16.mxu0 %v279_v4  ;;  %v291_v11 = vpack.c.bf16 %v112_v10, %v111_v9  ;;  %265 = vmatprep.mubr.msk.f32.mxu0 %vm23_vm0, %v21_v12  ;;  %v22_v13 = vld [vmem:[%s370_s1 + $0x8] sm:$0x1] }
   0x5   :  { %282 = vmatpush3.bf16.msra.mxu0 %v279_v4  ;;  %288 = vmatprep.subr.bf16.mxu1 %v287_v8 }
   0x6   :  { %114 = vxpose.xlu0.b32.cont [2/4] (short) (narrow) %v18_v1, 16  ;;  %290 = vmatpush3.bf16.msra.mxu1 %v287_v8 }
   0x7   :  { %284 = vmatprep.subr.bf16.mxu0 %v283_v7  ;;  %292 = vmatprep.subr.bf16.mxu1 %v291_v11 }
   0x9   :  { %286 = vmatpush3.bf16.msra.mxu0 %v283_v7 }
   0xa   :  { %115 = vxpose.xlu0.b32.cont [3/4] (short) (narrow) %v19_v2, 16  ;;  %294 = vmatpush3.bf16.msra.mxu1 %v291_v11 }
   0xc   :  { %266 = vmatmul.mubr.msk.f32.vlgmr.msra.gmra.mrb[0].mxu0 %vm23_vm0, %v22_v13 }
   0xe   :  { %116 = vxpose.xlu0.b32.end [4/4] (short) (narrow) %v20_v3, 16 }
  0x82   :  { %v129_v14 = vpop.trf.xlu0 }
  0x83   :  { %276 = vmatprep.mubr.msk.f32.mxu1 %vm23_vm0, %v129_v14 }
  0x86   :  { %v130_v15 = vpop.trf.xlu0 }
  0x87   :  { %277 = vmatmul.mubr.msk.f32.vlgmr.msra.gmra.mrb[0].mxu1 %vm23_vm0, %v130_v15 }
  0xdf   :  { %v267_v16 = vpop.f32.mrb[0].mxu0 }
  0xe0   :  { %108 = vst.msk [vmem:[%s371_s4] sm:$0x1] %vm107_vm1, %v267_v16  ;;  %v96_v17 = vpop.f32.mrb[1].mxu0 }
  0xe1   :  { %106 = vst.msk [vmem:[%s372_s3] sm:$0xff] %vm105_vm2, %v96_v17 }
 0x15a   :  { %v278_v18 = vpop.f32.mrb[0].mxu1 }
 0x15b   :  { %228 = vst.msk [vmem:[%s373_s5 + $0x8] sm:$0xff] %vm226_vm3, %v278_v18  ;;  %v217_v19 = vpop.f32.mrb[1].mxu1 }
 0x15c   :  { %227 = vst.msk [vmem:[%s373_s5] sm:$0xff] %vm226_vm3, %v217_v19 }

// kernel: gat_forward.6
= control target key start
LH: loop header
LB: loop body
LE: loop exit
PB: predicated region body
PF: predicated region fallthrough
CT: control target
= control target key end

     0   :  { %v509_v0 = vmov 1   ;;  %v510_v1 = vmov 0   ;;  %vm24_vm0 = vcmask 123904   ;;  %v511_v6 = vmov -inf   ;;  %s628_s2 = inlined_call_operand.vmem [shape: f32[16,2], index: 2, kind: input, shape index: {}]   ;;  %s629_s4 = inlined_call_operand.vmem [shape: f32[32,1], index: 4, kind: input, shape index: {}]   ;;  %s630_s1 = inlined_call_operand.vmem [shape: f32[32,16], index: 1, kind: input, shape index: {}]   ;;  %s631_s0 = inlined_call_operand.vmem [shape: bf16[16,16], index: 0, kind: input, shape index: {}]   ;;  %s632_s3 = inlined_call_operand.vmem [shape: f32[2,16], index: 3, kind: input, shape index: {}]   ;;  %s633_s5 = inlined_call_operand.vmem [shape: f32[32,16], index: 5, kind: output, shape index: {}]  }
   0x1   :  { %483 = vset.pattern.permute.xlu1 %v509_v0  ;;  %482 = vset.pattern.permute.xlu0 %v510_v1  ;;  %v44_v2 = vld [vmem:[%s628_s2] sm:$0xff]  ;;  %v45_v3 = vld [vmem:[%s628_s2 + $0x8] sm:$0xff]  ;;  %v358_v5 = vld [vmem:[%s629_s4 + $0x10] sm:$0xff]  ;;  %25 = vst.msk [vmem:[#allocation2] sm:$0x3] %vm24_vm0, %v511_v6  ;;  %vm27_vm1 = vcmask 130048   ;;  %v57_v12 = vlaneseq }
   0x2   :  { %203 = vperm.xlu1 %483, %v44_v2   ;;  %49 = vperm.xlu0 %482, %v44_v2   ;;  %v356_v4 = vld [vmem:[%s629_s4] sm:$0xff]  ;;  %v512_v7 = vmov 0.0   ;;  %v42_v9 = vld [vmem:[%s630_s1 + $0x10] sm:$0xff]  ;;  %v357_v10 = vld [vmem:[%s629_s4 + $0x8] sm:$0xff]  ;;  %vm106_vm2 = vcmask 122880  }
   0x3   :  { %26 = vst.msk [vmem:[#allocation3] sm:$0x3] %vm24_vm0, %v512_v7  ;;  %v40_v8 = vld [vmem:[%s630_s1] sm:$0xff]  ;;  %467 = vmatprep.mubr.msk.f32.mxu1 %vm27_vm1, %v42_v9  ;;  %v359_v11 = vld [vmem:[%s629_s4 + $0x18] sm:$0xff]  ;;  %v58_v13 = vshrl.u32 %v57_v12, 7 }
   0x4   :  { %29 = vst.msk [vmem:[#allocation4 + $0x8] sm:$0xff] %vm27_vm1, %v512_v7  ;;  %28 = vst.msk [vmem:[#allocation4] sm:$0xff] %vm27_vm1, %v512_v7  ;;  %460 = vmatprep.mubr.msk.f32.mxu0 %vm27_vm1, %v40_v8  ;;  %v445_v16 = vld [vmem:[%s631_s0] sm:$0xff]  }
   0x5   :  { %30 = vst.msk [vmem:[#allocation4 + $0x10] sm:$0xff] %vm27_vm1, %v512_v7  ;;  %31 = vst.msk [vmem:[#allocation4 + $0x18] sm:$0xff] %vm27_vm1, %v512_v7  ;;  %v573_v14 = vsub.s32 0, %v58_v13  ;;  %v212_v15 = vsub.s32 1, %v58_v13  ;;  %v46_v17 = vld [vmem:[%s632_s3] sm:$0x3]  ;;  %v446_v18 = vunpack.c.l.bf16 %v445_v16  ;;  %v447_v21 = vunpack.c.h.bf16 %v445_v16 }
   0x6   :  { %207 = vperm.xlu1 %483, %v45_v3   ;;  %54 = vperm.xlu0 %482, %v45_v3  }
   0x7   :  { %v213_v19 = vrot.slane %v46_v17, %v212_v15  ;;  %v60_v20 = vrot.slane %v46_v17, %v573_v14  ;;  %v434_v23 = vadd.f32 -1.0, %v446_v18  ;;  %v435_v29 = vadd.f32 -1.0, %v447_v21 }
   0x8   :  { %v222_v62 = vld [vmem:[#allocation2 + $0x1] sm:$0x1]  ;;  %v69_v63 = vld [vmem:[#allocation2] sm:$0x1] }
   0x9   :  { %v38_v30 = vmul.f32 1e+30, %v434_v23  ;;  %v39_v37 = vmul.f32 1e+30, %v435_v29 }
   0xa   :  { %373 = vperm.xlu0 %482, %v356_v4   ;;  %484 = vset.pattern.permute.xlu1 %v510_v1 }
   0xb   :  { %378 = vperm.xlu1 %484, %v357_v10  }
   0xe   :  { %408 = vperm.xlu0 %482, %v358_v5  }
   0xf   :  { %413 = vperm.xlu1 %484, %v359_v11  }
  0x81   :  { %v204_v22 = vpop.permute.xlu1 %203  ;;  %v50_v24 = vpop.permute.xlu0 %49 }
  0x82   :  { %v214_v25 = vadd.f32 %v213_v19, %v204_v22  ;;  %v61_v26 = vadd.f32 %v60_v20, %v50_v24 }
  0x84   :  { %v216_v27 = vmul.f32 0.2, %v214_v25  ;;  %v63_v28 = vmul.f32 0.2, %v61_v26 }
  0x85   :  { %v208_v31 = vpop.permute.xlu1 %207  ;;  %v55_v32 = vpop.permute.xlu0 %54 }
  0x86   :  { %v218_v33 = vmax.f32 %v214_v25, %v216_v27  ;;  %v65_v34 = vmax.f32 %v61_v26, %v63_v28  ;;  %v215_v35 = vadd.f32 %v213_v19, %v208_v31  ;;  %v62_v36 = vadd.f32 %v60_v20, %v55_v32  ;;  %v43_v32 = vld [vmem:[%s630_s1 + $0x18] sm:$0xff] }
  0x88   :  { %v217_v38 = vmul.f32 0.2, %v215_v35  ;;  %v64_v39 = vmul.f32 0.2, %v62_v36  ;;  %v220_v40 = vadd.f32 %v218_v33, %v38_v30  ;;  %v67_v41 = vadd.f32 %v65_v34, %v38_v30 }
  0x8a   :  { %v219_v42 = vmax.f32 %v215_v35, %v217_v38  ;;  %v66_v43 = vmax.f32 %v62_v36, %v64_v39  ;;  %v223_v46 = vsel %vm27_vm1, %v220_v40, -inf  ;;  %v71_v47 = vsel %vm27_vm1, %v67_v41, -inf  ;;  %v41_v35 = vld [vmem:[%s630_s1 + $0x8] sm:$0xff] }
  0x8c   :  { %v221_v44 = vadd.f32 %v219_v42, %v39_v37  ;;  %v68_v45 = vadd.f32 %v66_v43, %v39_v37 }
  0x8e   :  { %v224_v48 = vsel %vm27_vm1, %v221_v44, -inf  ;;  %v72_v49 = vsel %vm27_vm1, %v68_v45, -inf }
  0x8f   :  { %v225_v50 = vmax.f32 %v223_v46, %v224_v48  ;;  %v73_v51 = vmax.f32 %v71_v47, %v72_v49 }
  0x91   :  { %v226_v52 = vrot.slane %v225_v50, 4  ;;  %v74_v53 = vrot.slane %v73_v51, 4 }
  0x93   :  { %v227_v54 = vmax.f32 %v225_v50, %v226_v52  ;;  %v75_v55 = vmax.f32 %v73_v51, %v74_v53 }
  0x95   :  { %v228_v56 = vrot.slane %v227_v54, 2  ;;  %v76_v57 = vrot.slane %v75_v55, 2 }
  0x97   :  { %v229_v58 = vmax.f32 %v227_v54, %v228_v56  ;;  %v77_v59 = vmax.f32 %v75_v55, %v76_v57 }
  0x99   :  { %v230_v60 = vrot.slane %v229_v58, 1  ;;  %v78_v61 = vrot.slane %v77_v59, 1 }
  0x9b   :  { %v231_v0 = vmax.f32 %v229_v58, %v230_v60  ;;  %v79_v1 = vmax.f32 %v77_v59, %v78_v61  ;;  %v341_v58 = vld [vmem:[#allocation4 + $0x18] sm:$0xff]  ;;  %v340_v60 = vld [vmem:[#allocation4 + $0x10] sm:$0xff]  ;;  %v190_v61 = vld [vmem:[#allocation4 + $0x8] sm:$0xff] }
  0x9d   :  { %v232_v2 = vmax.f32 %v222_v62, %v231_v0  ;;  %v80_v3 = vmax.f32 %v69_v63, %v79_v1 }
  0x9f   :  { %v239_v4 = vrot.slane %v232_v2, %v573_v14  ;;  %352 = vst.msk [vmem:[#allocation2 + $0x1] sm:$0x1] %vm106_vm2, %v232_v2  ;;  %v87_v5 = vrot.slane %v80_v3, %v573_v14  ;;  %201 = vst.msk [vmem:[#allocation2] sm:$0x1] %vm106_vm2, %v80_v3  ;;  %v233_v15 = vsub.f32 %v222_v62, %v232_v2 }
  0xa0   :  { %v81_v16 = vsub.f32 %v69_v63, %v80_v3  ;;  %v189_v63 = vld [vmem:[#allocation4] sm:$0xff] }
  0xa1   :  { %v240_v6 = vsub.f32 %v220_v40, %v239_v4  ;;  %v241_v7 = vsub.f32 %v221_v44, %v239_v4  ;;  %v88_v8 = vsub.f32 %v67_v41, %v87_v5  ;;  %v89_v9 = vsub.f32 %v68_v45, %v87_v5  ;;  %v246_v41 = vld [vmem:[#allocation3 + $0x1] sm:$0x1]  ;;  %v94_v45 = vld [vmem:[#allocation3] sm:$0x1] }
  0xa2   :  { %v234_v17 = vmul.f32 1.442695, %v233_v15  ;;  %v82_v19 = vmul.f32 1.442695, %v81_v16 }
  0xa3   :  { %v242_v10 = vmul.f32 1.442695, %v240_v6  ;;  %v244_v11 = vmul.f32 1.442695, %v241_v7  ;;  %v90_v12 = vmul.f32 1.442695, %v88_v8 }
  0xa4   :  { %v92_v13 = vmul.f32 1.442695, %v89_v9 }
  0xa5   :  { %485 = vpow2.f32 %v242_v10 }
  0xa6   :  { %487 = vpow2.f32 %v244_v11 }
  0xa7   :  { %489 = vpow2.f32 %v90_v12  ;;  %v379_v12 = vpop.permute.xlu1 %378 }
  0xa8   :  { %491 = vpow2.f32 %v92_v13  ;;  %v374_v13 = vpop.permute.xlu0 %373 }
  0xa9   :  { %493 = vpow2.f32 %v234_v17 }
  0xaa   :  { %495 = vpow2.f32 %v82_v19 }
  0xaf   :  { %v486_v18 = vpop.eup %485 }
  0xb0   :  { %v488_v20 = vpop.eup %487  ;;  %v248_v21 = vsel %vm27_vm1, %v486_v18, 0.0 }
  0xb1   :  { %v490_v22 = vpop.eup %489  ;;  %v249_v23 = vsel %vm27_vm1, %v488_v20, 0.0  ;;  %v474_v24 = vpack.c.bf16 %v488_v20, %v486_v18 }
  0xb2   :  { %v492_v25 = vpop.eup %491  ;;  %v250_v26 = vadd.f32 %v249_v23, %v248_v21  ;;  %v96_v27 = vsel %vm27_vm1, %v490_v22, 0.0 }
  0xb3   :  { %v97_v28 = vsel %vm27_vm1, %v492_v25, 0.0  ;;  %v470_v29 = vpack.c.bf16 %v492_v25, %v490_v22  ;;  %475 = vmatprep.subr.bf16.mxu1 %v474_v24  ;;  %v494_v40 = vpop.eup %493  ;;  %v414_v22 = vpop.permute.xlu1 %413 }
  0xb4   :  { %v251_v30 = vrot.slane %v250_v26, 4  ;;  %v98_v31 = vadd.f32 %v97_v28, %v96_v27  ;;  %477 = vmatpush3.bf16.msra.mxu1 %v474_v24  ;;  %v496_v44 = vpop.eup %495  ;;  %v247_v48 = vmul.f32 %v494_v40, %v246_v41  ;;  %v345_v57 = vrot.slane %v494_v40, %v573_v14  ;;  %v409_v24 = vpop.permute.xlu0 %408 }
  0xb5   :  { %471 = vmatprep.subr.bf16.mxu0 %v470_v29  ;;  %v95_v50 = vmul.f32 %v496_v44, %v94_v45  ;;  %v194_v59 = vrot.slane %v496_v44, %v573_v14 }
  0xb6   :  { %v252_v33 = vadd.f32 %v251_v30, %v250_v26  ;;  %v99_v34 = vrot.slane %v98_v31, 4  ;;  %473 = vmatpush3.bf16.msra.mxu0 %v470_v29  ;;  %v347_v62 = vmul.f32 %v345_v57, %v341_v58  ;;  %v346_v1 = vmul.f32 %v345_v57, %v340_v60 }
  0xb7   :  { %468 = vmatmul.mubr.msk.f32.vlgmr.msra.gmra.mrb[0].mxu1 %vm27_vm1, %v43_v32  ;;  %v196_v2 = vmul.f32 %v194_v59, %v190_v61  ;;  %v195_v6 = vmul.f32 %v194_v59, %v189_v63 }
  0xb8   :  { %v253_v36 = vrot.slane %v252_v33, 2  ;;  %v100_v37 = vadd.f32 %v99_v34, %v98_v31 }
  0xb9   :  { %461 = vmatmul.mubr.msk.f32.vlgmr.msra.gmra.mrb[0].mxu0 %vm27_vm1, %v41_v35 }
  0xba   :  { %v254_v38 = vadd.f32 %v253_v36, %v252_v33  ;;  %v101_v39 = vrot.slane %v100_v37, 2 }
  0xbc   :  { %v255_v42 = vrot.slane %v254_v38, 1  ;;  %v102_v43 = vadd.f32 %v101_v39, %v100_v37 }
  0xbe   :  { %v256_v46 = vadd.f32 %v255_v42, %v254_v38  ;;  %v103_v47 = vrot.slane %v102_v43, 1 }
  0xc0   :  { %v104_v49 = vadd.f32 %v103_v47, %v102_v43  ;;  %v257_v51 = vadd.f32 %v256_v46, %v247_v48 }
  0xc2   :  { %v105_v52 = vadd.f32 %v104_v49, %v95_v50  ;;  %258 = vst.msk [vmem:[#allocation3 + $0x1] sm:$0x1] %vm106_vm2, %v257_v51 }
  0xc4   :  { %107 = vst.msk [vmem:[#allocation3] sm:$0x1] %vm106_vm2, %v105_v52 }
  0xc9   :  { %v395_v53 = vld [vmem:[#allocation3 + $0x1] sm:$0x1] }
  0xca   :  { %v396_v55 = vmax.f32 %v395_v53, 1e-20 }
  0xcb   :  { %v360_v54 = vld [vmem:[#allocation3] sm:$0x1] }
  0xcc   :  { %v361_v56 = vmax.f32 %v360_v54, 1e-20  ;;  %497 = vrcp.f32 %v396_v55 }
  0xce   :  { %499 = vrcp.f32 %v361_v56 }
  0xd6   :  { %v498_v11 = vpop.eup %497 }
  0xd7   :  { %v403_v16 = vrot.slane %v498_v11, %v573_v14 }
  0xd8   :  { %v500_v15 = vpop.eup %499 }
  0xd9   :  { %v368_v18 = vrot.slane %v500_v15, %v573_v14 }
 0x18a   :  { %v469_v0 = vpop.f32.mrb[0].mxu1 }
 0x18b   :  { %v349_v3 = vadd.f32 %v469_v0, %v347_v62  ;;  %v331_v4 = vpop.f32.mrb[1].mxu1 }
 0x18c   :  { %v462_v5 = vpop.f32.mrb[0].mxu0  ;;  %v348_v7 = vadd.f32 %v346_v1, %v331_v4 }
 0x18d   :  { %v198_v8 = vadd.f32 %v462_v5, %v196_v2  ;;  %351 = vst.msk [vmem:[#allocation4 + $0x18] sm:$0xff] %vm27_vm1, %v349_v3  ;;  %v180_v9 = vpop.f32.mrb[1].mxu0 }
 0x18e   :  { %v197_v10 = vadd.f32 %v195_v6, %v180_v9  ;;  %350 = vst.msk [vmem:[#allocation4 + $0x10] sm:$0xff] %vm27_vm1, %v348_v7 }
 0x18f   :  { %200 = vst.msk [vmem:[#allocation4 + $0x8] sm:$0xff] %vm27_vm1, %v198_v8 }
 0x190   :  { %199 = vst.msk [vmem:[#allocation4] sm:$0xff] %vm27_vm1, %v197_v10 }
 0x194   :  { %v399_v17 = vld [vmem:[#allocation4 + $0x18] sm:$0xff] }
 0x195   :  { %v398_v19 = vld [vmem:[#allocation4 + $0x10] sm:$0xff]  ;;  %v405_v20 = vmul.f32 %v403_v16, %v399_v17 }
 0x196   :  { %v364_v21 = vld [vmem:[#allocation4 + $0x8] sm:$0xff]  ;;  %v404_v23 = vmul.f32 %v403_v16, %v398_v19 }
 0x197   :  { %v363_v25 = vld [vmem:[#allocation4] sm:$0xff]  ;;  %v370_v26 = vmul.f32 %v368_v18, %v364_v21  ;;  %v417_v27 = vadd.f32 %v414_v22, %v405_v20 }
 0x198   :  { %v369_v28 = vmul.f32 %v368_v18, %v363_v25  ;;  %v416_v29 = vadd.f32 %v409_v24, %v404_v23 }
 0x199   :  { %v382_v30 = vadd.f32 %v379_v12, %v370_v26  ;;  %v422_v31 = vmul.f32 1.442695, %v417_v27  ;;  %vm419_vm3 = vcmp.gt.f32.partialorder %v417_v27, 0.0 }
 0x19a   :  { %v381_v32 = vadd.f32 %v374_v13, %v369_v28  ;;  %v420_v33 = vmul.f32 1.442695, %v416_v29  ;;  %vm418_vm4 = vcmp.gt.f32.partialorder %v416_v29, 0.0 }
 0x19b   :  { %v387_v34 = vmul.f32 1.442695, %v382_v30  ;;  %501 = vpow2.f32 %v422_v31  ;;  %vm384_vm5 = vcmp.gt.f32.partialorder %v382_v30, 0.0 }
 0x19c   :  { %v385_v35 = vmul.f32 1.442695, %v381_v32  ;;  %503 = vpow2.f32 %v420_v33  ;;  %vm383_vm6 = vcmp.gt.f32.partialorder %v381_v32, 0.0 }
 0x19d   :  { %505 = vpow2.f32 %v387_v34 }
 0x19e   :  { %507 = vpow2.f32 %v385_v35 }
 0x1a5   :  { %v502_v14 = vpop.eup %501 }
 0x1a6   :  { %v504_v36 = vpop.eup %503  ;;  %v443_v37 = vadd.f32 -1.0, %v502_v14 }
 0x1a7   :  { %v506_v38 = vpop.eup %505  ;;  %v442_v39 = vadd.f32 -1.0, %v504_v36 }
 0x1a8   :  { %v508_v40 = vpop.eup %507  ;;  %v441_v41 = vadd.f32 -1.0, %v506_v38  ;;  %v427_v42 = vsel %vm419_vm3, %v417_v27, %v443_v37 }
 0x1a9   :  { %v440_v43 = vadd.f32 -1.0, %v508_v40  ;;  %v426_v44 = vsel %vm418_vm4, %v416_v29, %v442_v39  ;;  %429 = vst.msk [vmem:[%s633_s5 + $0x18] sm:$0xff] %vm27_vm1, %v427_v42 }
 0x1aa   :  { %v392_v45 = vsel %vm384_vm5, %v382_v30, %v441_v41  ;;  %428 = vst.msk [vmem:[%s633_s5 + $0x10] sm:$0xff] %vm27_vm1, %v426_v44 }
 0x1ab   :  { %v391_v46 = vsel %vm383_vm6, %v381_v32, %v440_v43  ;;  %394 = vst.msk [vmem:[%s633_s5 + $0x8] sm:$0xff] %vm27_vm1, %v392_v45 }
 0x1ac   :  { %393 = vst.msk [vmem:[%s633_s5] sm:$0xff] %vm27_vm1, %v391_v46 }

// kernel: gat_forward.8
= control target key start
LH: loop header
LB: loop body
LE: loop exit
PB: predicated region body
PF: predicated region fallthrough
CT: control target
= control target key end

     0   :  { %v260_v0 = vmov 0   ;;  %vm24_vm0 = vcmask 122880   ;;  %v261_v3 = vmov -inf   ;;  %vm27_vm1 = vcmask 130048   ;;  %s328_s2 = inlined_call_operand.vmem [shape: f32[16,1], index: 2, kind: input, shape index: {}]   ;;  %s329_s4 = inlined_call_operand.vmem [shape: f32[8,1], index: 4, kind: input, shape index: {}]   ;;  %s330_s0 = inlined_call_operand.vmem [shape: bf16[16,16], index: 0, kind: input, shape index: {}]   ;;  %s331_s3 = inlined_call_operand.vmem [shape: f32[1,16], index: 3, kind: input, shape index: {}]   ;;  %s332_s1 = inlined_call_operand.vmem [shape: f32[8,16], index: 1, kind: input, shape index: {}]   ;;  %s333_s5 = inlined_call_operand.vmem [shape: f32[8,16], index: 5, kind: output, shape index: {}]  }
   0x1   :  { %248 = vset.pattern.permute.xlu0 %v260_v0  ;;  %v38_v1 = vld [vmem:[%s328_s2] sm:$0xff]  ;;  %249 = vset.pattern.permute.xlu1 %v260_v0  ;;  %v39_v2 = vld [vmem:[%s328_s2 + $0x8] sm:$0xff]  ;;  %25 = vst.msk [vmem:[#allocation2] sm:$0x1] %vm24_vm0, %v261_v3  ;;  %v262_v4 = vmov 0.0   ;;  %v263_v5 = vmov 0.0|0.0   ;;  %v81_v29 = vlaneseq }
   0x2   :  { %43 = vperm.xlu0 %248, %v38_v1   ;;  %26 = vst.msk [vmem:[#allocation3] sm:$0x1] %vm24_vm0, %v262_v4  ;;  %240 = vmatprep.subr.bf16.mxu0 %v263_v5  ;;  %vm264_vm2 = vmmov 0   ;;  %v193_v6 = vld [vmem:[%s329_s4] sm:$0xff] }
   0x3   :  { %28 = vst.msk [vmem:[#allocation4] sm:$0xff] %vm27_vm1, %v262_v4  ;;  %237 = vmatprep.mubr.msk.f32.mxu0 %vm264_vm2, %v262_v4  ;;  %207 = vperm.xlu1 %249, %v193_v6   ;;  %v227_v7 = vld [vmem:[%s330_s0] sm:$0xff]   ;;  %v82_v32 = vshrl.u32 %v81_v29, 7 }
   0x4   :  { %v228_v8 = vunpack.c.l.bf16 %v227_v7  ;;  %v223_v9 = vld [vmem:[%s331_s3] ss:$0 sm:$0xff]  ;;  %v229_v10 = vunpack.c.h.bf16 %v227_v7 }
   0x5   :  { %v83_v36 = vsub.s32 0, %v82_v32  ;;  %v37_v54 = vld [vmem:[%s332_s1] sm:$0xff] }
   0x6   :  { %48 = vperm.xlu0 %248, %v39_v2   ;;  %v221_v12 = vadd.f32 -1.0, %v228_v8  ;;  %v222_v15 = vadd.f32 -1.0, %v229_v10 }
   0x8   :  { %v35_v17 = vmul.f32 1e+30, %v221_v12  ;;  %v36_v20 = vmul.f32 1e+30, %v222_v15  ;;  %v65_v35 = vld [vmem:[#allocation2] sm:$0x1] }
   0x9   :  { %v92_v59 = vld [vmem:[#allocation3] sm:$0x1] }
   0xa   :  { %v179_v2 = vld [vmem:[#allocation4] sm:$0xff] }
  0x81   :  { %v44_v11 = vpop.permute.xlu0 %43 }
  0x82   :  { %v57_v13 = vadd.f32 %v223_v9, %v44_v11 }
  0x84   :  { %v59_v14 = vmul.f32 0.2, %v57_v13 }
  0x85   :  { %v49_v16 = vpop.permute.xlu0 %48 }
  0x86   :  { %v61_v18 = vmax.f32 %v57_v13, %v59_v14  ;;  %v58_v19 = vadd.f32 %v223_v9, %v49_v16  ;;  %v208_v9 = vpop.permute.xlu1 %207 }
  0x88   :  { %v60_v21 = vmul.f32 0.2, %v58_v19  ;;  %v63_v22 = vadd.f32 %v61_v18, %v35_v17 }
  0x8a   :  { %v62_v23 = vmax.f32 %v58_v19, %v60_v21  ;;  %v67_v25 = vsel %vm27_vm1, %v63_v22, -inf }
  0x8c   :  { %v64_v24 = vadd.f32 %v62_v23, %v36_v20 }
  0x8e   :  { %v68_v26 = vsel %vm27_vm1, %v64_v24, -inf }
  0x8f   :  { %v69_v27 = vmax.f32 %v67_v25, %v68_v26 }
  0x91   :  { %v70_v28 = vrot.slane %v69_v27, 4 }
  0x93   :  { %v71_v30 = vmax.f32 %v69_v27, %v70_v28 }
  0x95   :  { %v72_v31 = vrot.slane %v71_v30, 2 }
  0x97   :  { %v73_v33 = vmax.f32 %v71_v30, %v72_v31 }
  0x99   :  { %v74_v34 = vrot.slane %v73_v33, 1 }
  0x9b   :  { %v75_v37 = vmax.f32 %v73_v33, %v74_v34 }
  0x9d   :  { %v76_v38 = vmax.f32 %v65_v35, %v75_v37 }
  0x9f   :  { %v77_v39 = vsub.f32 %v65_v35, %v76_v38  ;;  %v84_v40 = vrot.slane %v76_v38, %v83_v36  ;;  %189 = vst.msk [vmem:[#allocation2] sm:$0x1] %vm24_vm0, %v76_v38 }
  0xa1   :  { %v78_v41 = vmul.f32 1.442695, %v77_v39  ;;  %v86_v42 = vsub.f32 %v63_v22, %v84_v40  ;;  %v87_v43 = vsub.f32 %v64_v24, %v84_v40 }
  0xa3   :  { %250 = vpow2.f32 %v78_v41  ;;  %v88_v44 = vmul.f32 1.442695, %v86_v42  ;;  %v90_v45 = vmul.f32 1.442695, %v87_v43 }
  0xa5   :  { %252 = vpow2.f32 %v88_v44 }
  0xa6   :  { %254 = vpow2.f32 %v90_v45 }
  0xad   :  { %v251_v46 = vpop.eup %250 }
  0xae   :  { %v184_v47 = vrot.slane %v251_v46, %v83_v36  ;;  %v93_v61 = vmul.f32 %v251_v46, %v92_v59 }
  0xaf   :  { %v253_v48 = vpop.eup %252 }
  0xb0   :  { %v255_v49 = vpop.eup %254  ;;  %v94_v50 = vsel %vm27_vm1, %v253_v48, 0.0  ;;  %v186_v3 = vmul.f32 %v184_v47, %v179_v2 }
  0xb1   :  { %v95_v51 = vsel %vm27_vm1, %v255_v49, 0.0  ;;  %v241_v52 = vpack.c.bf16 %v255_v49, %v253_v48 }
  0xb2   :  { %v96_v53 = vadd.f32 %v95_v51, %v94_v50 }
  0xb3   :  { %242 = vmatpush3.bf16.msra.mxu0 %v241_v52 }
  0xb4   :  { %v97_v55 = vrot.slane %v96_v53, 4 }
  0xb6   :  { %v98_v56 = vadd.f32 %v97_v55, %v96_v53  ;;  %238 = vmatmul.mubr.msk.f32.vlgmr.msra.gmra.mrb[0].mxu0 %vm27_vm1, %v37_v54 }
  0xb8   :  { %v99_v57 = vrot.slane %v98_v56, 2 }
  0xba   :  { %v100_v58 = vadd.f32 %v99_v57, %v98_v56 }
  0xbc   :  { %v101_v60 = vrot.slane %v100_v58, 1 }
  0xbe   :  { %v102_v62 = vadd.f32 %v101_v60, %v100_v58 }
  0xc0   :  { %v103_v63 = vadd.f32 %v102_v62, %v93_v61 }
  0xc2   :  { %105 = vst.msk [vmem:[#allocation3] sm:$0x1] %vm24_vm0, %v103_v63 }
  0xc9   :  { %v194_v0 = vld [vmem:[#allocation3] sm:$0x1] }
  0xca   :  { %v195_v1 = vmax.f32 %v194_v0, 1e-20 }
  0xcc   :  { %256 = vrcp.f32 %v195_v1 }
  0xd6   :  { %v257_v7 = vpop.eup %256 }
  0xd7   :  { %v202_v8 = vrot.slane %v257_v7, %v83_v36 }
 0x189   :  { %v175_v4 = vpop.f32.mrb[0].mxu0 }
 0x18a   :  { %v187_v5 = vadd.f32 %v186_v3, %v175_v4  ;;  %v239_v6 = vpop.f32.mrb[1].mxu0 }
 0x18c   :  { %188 = vst.msk [vmem:[#allocation4] sm:$0xff] %vm27_vm1, %v187_v5 }
 0x193   :  { %v197_v10 = vld [vmem:[#allocation4] sm:$0xff] }
 0x194   :  { %v204_v11 = vmul.f32 %v202_v8, %v197_v10 }
 0x196   :  { %v210_v12 = vadd.f32 %v208_v9, %v204_v11 }
 0x198   :  { %v212_v13 = vmul.f32 1.442695, %v210_v12  ;;  %vm211_vm3 = vcmp.gt.f32.partialorder %v210_v12, 0.0 }
 0x19a   :  { %258 = vpow2.f32 %v212_v13 }
 0x1a4   :  { %v259_v14 = vpop.eup %258 }
 0x1a5   :  { %v225_v15 = vadd.f32 -1.0, %v259_v14 }
 0x1a7   :  { %v215_v16 = vsel %vm211_vm3, %v210_v12, %v225_v15 }
 0x1a8   :  { %216 = vst.msk [vmem:[%s333_s5] sm:$0xff] %vm27_vm1, %v215_v16 }

// kernel: gat_forward.9
= control target key start
LH: loop header
LB: loop body
LE: loop exit
PB: predicated region body
PF: predicated region fallthrough
CT: control target
= control target key end

     0   :  { %vm31_vm0 = vcmask 64512   ;;  %v173_v2 = vmov 0.0   ;;  %vm174_vm1 = vmmov 0   ;;  %s237_s0 = inlined_call_operand.vmem [shape: f32[8,16], index: 0, kind: input, shape index: {}]   ;;  %s238_s1 = inlined_call_operand.vmem [shape: f32[8,16], index: 1, kind: input, shape index: {}]   ;;  %s239_s2 = inlined_call_operand.vmem [shape: f32[8,8], index: 2, kind: input, shape index: {}]   ;;  %s240_s3 = inlined_call_operand.vmem [shape: f32[8,1], index: 3, kind: input, shape index: {}]   ;;  %s241_s4 = inlined_call_operand.<no memory space> [shape: f32[1], index: 4, kind: input, shape index: {}]   ;;  %s242_s5 = inlined_call_operand.hbm [shape: f32[8,16], index: 5, kind: output, shape index: {}]  }
   0x1   :  { %v24_v0 = vld [vmem:[%s238_s1] sm:$0xff]  ;;  %137 = vmatprep.subr.mxu0 %v173_v2  ;;  %139 = vmatprep.mubr.msk.f32.mxu0 %vm174_vm1, %v173_v2 }
   0x2   :  { %v23_v1 = vld [vmem:[%s239_s2] sm:$0xff] }
   0x3   :  { %v25_v3 = vld [vmem:[%s240_s3] sm:$0xff] }
   0x4   :  { %11 = vsyncpa [#allocation4], 0  ;;  %138 = vmatpush3.msra.mxu0 %v24_v0  ;;  %v175_v4 = vmov 0   ;;  %s108_s24 = ssub.f32 1.0, %s241_s4  ;;  %v105_v10 = vld [vmem:[%s237_s0] sm:$0xff]  ;;  %v106_v11 = vstv %s241_s4  ;;  %s176_s28 = smov [#allocation3]  }
   0x5   :  { %146 = vset.pattern.permute.xlu0 %v175_v4  ;;  %140 = vmatmul.mubr.msk.f32.vlgmr.msra.gmra.mrb[0].mxu0 %vm31_vm0, %v23_v1  ;;  %v107_v15 = vmul.f32 %v106_v11, %v105_v10  ;;  %s125_s29 = sshll.u32 %s176_s28, 4  ;;  %vm117_vm3 = vcmask 130048   ;;  %s126_s29 = int_to_ptr.vmem [resolvable:$true] %s125_s29 }
   0x6   :  { %28 = vperm.xlu0 %146, %v25_v3   ;;  %v114_v14 = vstv %s108_s24  ;;  %s149_s30 = scalar_lea.vmem %s126_s29, 128  ;;  %p154_p1 = scmp.lt.s32.totalorder %s126_s29, %s126_s29 }
   0x7   :  { %p150_p0 = scmp.ne.s32.totalorder %s126_s29, %s149_s30  ;;  %p155_p2 = scmp.lt.s32.totalorder %s149_s30, %s149_s30 }
   0x9   :  { %p156_p3 = por %p155_p2, %p154_p1 }
   0xb   :  { %p157_p4 = pnand %p156_p3, %p150_p0 }
  0x85   :  { %v29_v5 = vpop.permute.xlu0 %28 }
  0xd8   :  { %v101_v6 = vpop.f32.mrb[0].mxu0 }
  0xd9   :  { %v102_v7 = vadd.f32 %v101_v6, %v29_v5  ;;  %v141_v8 = vpop.f32.mrb[1].mxu0 }
  0xdb   :  { %v110_v9 = vmul.f32 1.442695, %v102_v7  ;;  %vm109_vm2 = vcmp.gt.f32.partialorder %v102_v7, 0.0 }
  0xdd   :  { %147 = vpow2.f32 %v110_v9 }
  0xe7   :  { %v148_v12 = vpop.eup %147 }
  0xe8   :  { %v134_v13 = vadd.f32 -1.0, %v148_v12 }
  0xea   :  { %v113_v16 = vsel %vm109_vm2, %v102_v7, %v134_v13 }
  0xeb   :  { %v115_v17 = vmul.f32 %v114_v14, %v113_v16 }
  0xed   :  { %v116_v18 = vadd.f32 %v115_v17, %v107_v15 }
  0xef   :  { %118 = vst.msk [vmem:[#allocation3] sm:$0xff] %vm117_vm3, %v116_v18 }
  0xf0   :  { %160 = shalt.err (!%p157_p4)
}
  0xf1   :  { %s161_s6 = scalar_lea.hbm %s242_s5, 128 }
  0xf2   :  { %p162_p5 = scmp.ne.s32.totalorder %s242_s5, %s161_s6  ;;  %p165_p6 = scmp.lt.u32.totalorder %s161_s6, %s242_s5 }
  0xf4   :  { %p167_p7 = pnand %p165_p6, %p162_p5 }
  0xf6   :  { %170 = shalt.err (!%p167_p7)
}
  0xf7   :  { %128 = dma.vmem_to_hbm [thread:$0]  %s126_s29, 128, %s242_s5, [#allocation4]  }
  0xf8   :  { %171 = dma.done.wait [#allocation4], 128  }
  0xf9   :  { %172 = vsyncadd [#allocation4], 4294967168 }
  0xfa   :  { %132 = vsyncpa [#allocation4], 1 }

</bundles_post_ra>
